<compile_context>
chip_gen: v6e
topology: v6e:2x2x1
jax: 0.10.0
libtpu: 0.0.40
codegen_flags: <defaults>
</compile_context>

<pallas_src>
import jax
import jax.numpy as jnp
from jax.experimental import pallas as pl
from jax.experimental.pallas import tpu as pltpu

# ---------------- small synthetic BERT config ----------------
B = 2             # batch
S = 8             # sequence length
H = 128           # hidden size (lane-dense)
NUM_HEADS = 4
HEAD_DIM = H // NUM_HEADS      # 32
INTER = 128       # FFN intermediate size
V = 128           # vocab size (>= mask id)
MAX_POS = 16
NUM_LAYERS = 2
MASK_ID = 103     # BERT's [MASK] token id
NUM_MASKS = 2     # one [MASK] per batch row in the example input
NUM_OPTIONS = 4   # option_ids shape = (NUM_OPTIONS, OPT_SUBTOKENS)
OPT_SUBTOKENS = 3
LN_EPS = 1e-12
T = B * S                      # 16 query rows
NT = NUM_HEADS * T             # 64 stacked-head key rows
NEG = -1e30                    # finite "masked out" additive value

# packed-operand row indices
_BQ, _BK, _BV, _BO, _L1G, _L1B, _B1, _B2, _L2G, _L2B = range(10)   # layer_vecs
_EG, _EB, _MB, _MG, _MBETA, _DB = range(6)                          # global_vecs
_HM0 = 6                                  # global_vecs rows 6..9 = per-head lane masks


# ---------------- shared math helpers (f32) ----------------
def _layernorm(x, g, b):
    mu = jnp.mean(x, axis=-1, keepdims=True)
    var = jnp.mean((x - mu) ** 2, axis=-1, keepdims=True)
    return (x - mu) * jax.lax.rsqrt(var + LN_EPS) * g + b


def _gelu(x):
    # TODO(synk): BERT uses exact erf-GELU; tanh approximation keeps the math on the EUP.
    c = 0.7978845608028654  # sqrt(2/pi)
    return 0.5 * x * (1.0 + jnp.tanh(c * (x + 0.044715 * x * x * x)))


# ---------------- the fused kernel ----------------
def fused_cloze_kernel(maskpos_ref, optids_ref,                 # SMEM scalars
                       tok_ref, wordemb_ref, postype_ref,
                       attnbias_ref, segones_ref,
                       wqkv_ref, wo_ref, w1_ref, w2_ref,
                       mlmw_ref, decw_ref,
                       lvecs_ref, gvecs_ref,
                       out_ref, x_scr):
    gv = gvecs_ref[...]                                          # (6+NH, 128) f32

    # ---- embedding: one-hot(token) @ word_emb on the MXU, + pos/type, LN ----
    vlane = jax.lax.broadcasted_iota(jnp.int32, (T, V), 1)
    onehot = jnp.where(vlane == tok_ref[...], 1.0, 0.0).astype(jnp.bfloat16)
    emb = jnp.dot(onehot, wordemb_ref[...], preferred_element_type=jnp.float32)
    x = _layernorm(emb + postype_ref[...], gv[_EG:_EG + 1], gv[_EB:_EB + 1])

    hm = gv[_HM0:_HM0 + NUM_HEADS]          # (NH, H) per-head 0/1 lane masks
    bias = attnbias_ref[...]                # (T, NT) block-diagonal sequence bias
    seg1 = segones_ref[...]                 # (NT, NT) head-segment block-ones
    scale = jnp.float32(1.0 / (HEAD_DIM ** 0.5))

    # ---- encoder layers (weights stacked on a leading layer axis) ----
    for l in range(NUM_LAYERS):
        lv = lvecs_ref[l]                                        # (10, 128) f32
        xb = x.astype(jnp.bfloat16)

        # fused QKV: one (T,H)x(H,3H) matmul, slice at 128-lane boundaries
        qkv = jnp.dot(xb, wqkv_ref[l], preferred_element_type=jnp.float32)
        q = (qkv[:, 0 * H:1 * H] + lv[_BQ:_BQ + 1]) * scale      # 1/sqrt(d) hoisted to Q
        k = qkv[:, 1 * H:2 * H] + lv[_BK:_BK + 1]
        v = qkv[:, 2 * H:3 * H] + lv[_BV:_BV + 1]

        # stack heads on the key axis: kb/vb[n*T + t, h] = {k,v}[t, h] * hm[n, h]
        # (elementwise kept in f32; bf16 only right before each dot — v5e VPU path)
        kb = jnp.concatenate([k * hm[n:n + 1] for n in range(NUM_HEADS)], axis=0)
        vb = jnp.concatenate([v * hm[n:n + 1] for n in range(NUM_HEADS)], axis=0)

        # all-head scores in ONE 2-D MXU op
        s = jnp.dot(q.astype(jnp.bfloat16), kb.T.astype(jnp.bfloat16),
                    preferred_element_type=jnp.float32) + bias   # (T, NT)
        # TODO(synk): global row-max (not per-head) is fine at these score
        # magnitudes; switch to a segmented max if scores ever grow large.
        s = s - jnp.max(s, axis=-1, keepdims=True)
        p = jnp.exp(s)
        # per-head softmax denominator, broadcast back to its 16-lane segment
        denom = jnp.dot(p, seg1, preferred_element_type=jnp.float32)
        p = p * pl.reciprocal(denom, approx=True)

        # context for ALL heads in ONE 2-D MXU op; the disjoint head lane masks
        # in vb make the head-sum land in the right lane block automatically.
        ctx = jnp.dot(p.astype(jnp.bfloat16), vb.astype(jnp.bfloat16),
                      preferred_element_type=jnp.float32)        # (T, H)

        attn = jnp.dot(ctx.astype(jnp.bfloat16), wo_ref[l],
                       preferred_element_type=jnp.float32) + lv[_BO:_BO + 1]
        h1 = _layernorm(x + attn, lv[_L1G:_L1G + 1], lv[_L1B:_L1B + 1])

        ff1 = _gelu(jnp.dot(h1.astype(jnp.bfloat16), w1_ref[l],
                            preferred_element_type=jnp.float32) + lv[_B1:_B1 + 1])
        ff2 = jnp.dot(ff1.astype(jnp.bfloat16), w2_ref[l],
                      preferred_element_type=jnp.float32) + lv[_B2:_B2 + 1]
        x = _layernorm(h1 + ff2, lv[_L2G:_L2G + 1], lv[_L2B:_L2B + 1])

    # ---- gather ONLY the [MASK] rows (dynamic sublane slices, positions in SMEM) ----
    x_scr[...] = x
    xh = jnp.concatenate(
        [x_scr[pl.ds(maskpos_ref[m], 1), :] for m in range(NUM_MASKS)], axis=0)

    # ---- MLM head on the NUM_MASKS rows only; (B,S,V) logits never materialised ----
    hh = _gelu(jnp.dot(xh.astype(jnp.bfloat16), mlmw_ref[...],
                       preferred_element_type=jnp.float32) + gv[_MB:_MB + 1])
    hh = _layernorm(hh, gv[_MG:_MG + 1], gv[_MBETA:_MBETA + 1])
    logits = jnp.dot(hh.astype(jnp.bfloat16), decw_ref[...],
                     preferred_element_type=jnp.float32) + gv[_DB:_DB + 1]   # (M, V)

    # ---- option scoring: additive vocab mask built from SMEM option ids ----
    vrow = jax.lax.broadcasted_iota(jnp.int32, (1, V), 1)
    cols = []
    for g in range(NUM_OPTIONS):
        hit = vrow == optids_ref[g * OPT_SUBTOKENS]
        for s_i in range(1, OPT_SUBTOKENS):
            hit = jnp.logical_or(hit, vrow == optids_ref[g * OPT_SUBTOKENS + s_i])
        obias = jnp.where(hit, 0.0, NEG)                         # (1, V)
        cols.append(jnp.max(logits + obias, axis=-1, keepdims=True))
    out_ref[...] = jnp.concatenate(cols, axis=-1)                # (NUM_MASKS, NUM_OPTIONS)


# ---------------- wrapper ----------------
def _vmem():
    return pl.BlockSpec(memory_space=pltpu.MemorySpace.VMEM)


def _smem():
    return pl.BlockSpec(memory_space=pltpu.MemorySpace.SMEM)


@jax.jit
def cloze_forward(token_ids, option_ids, params):
    # attention_mask = ones_like(token_ids) -> only the per-sequence block-diagonal
    # bias matters; it is precomputed in init_params.  Host keeps ONLY the
    # dynamic-shaped nonzero; embedding + option-mask build run inside the kernel.
    bidx, tidx = jnp.nonzero(token_ids == MASK_ID, size=NUM_MASKS)
    mask_pos = (bidx * S + tidx).astype(jnp.int32)               # (NUM_MASKS,)
    tok_col = token_ids.reshape(T, 1).astype(jnp.int32)          # (T, 1)
    opt_flat = option_ids.reshape(-1).astype(jnp.int32)          # (NUM_OPTIONS*OPT_SUBTOKENS,)

    args = (mask_pos, opt_flat, tok_col,
            params["word_emb"], params["pos_type_emb"],
            params["attn_bias"], params["seg_ones"],
            params["wqkv"], params["wo"], params["w1"], params["w2"],
            params["mlm_w"], params["dec_wT"],
            params["layer_vecs"], params["global_vecs"])

    # TODO(synk): at real BERT sizes, grid over layers (stream per-layer weights with
    # pl.Buffered(2) specs; split w1/w2 along INTER for v7x's 64 MiB VMEM) and add a
    # "parallel" batch/sequence axis so v7x's second TensorCore is used.
    return pl.pallas_call(
        fused_cloze_kernel,
        out_shape=jax.ShapeDtypeStruct((NUM_MASKS, NUM_OPTIONS), jnp.float32),
        in_specs=[_smem(), _smem()] + [_vmem()] * (len(args) - 2),
        out_specs=_vmem(),
        scratch_shapes=[pltpu.VMEM((T, H), jnp.float32)],
    )(*args)


# ---------------- parameters (packed, matmul weights bf16) ----------------
def init_params(key):
    keys = iter(jax.random.split(key, 64))
    rnd = lambda shape: 0.02 * jax.random.normal(next(keys), shape, jnp.float32)

    word_emb = rnd((V, H))
    pos_emb = rnd((MAX_POS, H))
    type_emb = rnd((2, H))
    pos_type = jnp.tile(pos_emb[:S] + type_emb[0][None, :], (B, 1))      # (T, H)

    # per-head 0/1 lane masks (heads own disjoint 32-lane blocks of H=128)
    head_ids = jnp.arange(H, dtype=jnp.int32) // HEAD_DIM
    head_mask = (head_ids[None, :] ==
                 jnp.arange(NUM_HEADS, dtype=jnp.int32)[:, None]).astype(jnp.float32)

    # block-diagonal (same-sequence) additive bias over the stacked-head key axis
    qseq = jnp.arange(T) // S
    kseq = (jnp.arange(NT) % T) // S
    attn_bias = jnp.where(qseq[:, None] == kseq[None, :], 0.0, NEG).astype(jnp.float32)

    # head-segment block-ones matrix for the segmented softmax denominator
    seg = jnp.arange(NT) // T
    seg_ones = (seg[:, None] == seg[None, :]).astype(jnp.float32)        # (NT, NT)

    # encoder weights, QKV pre-concatenated along the output (lane) axis
    wq, wk, wv, wo, w1, w2 = ([] for _ in range(6))
    for _ in range(NUM_LAYERS):
        wq.append(rnd((H, H))); wk.append(rnd((H, H))); wv.append(rnd((H, H)))
        wo.append(rnd((H, H))); w1.append(rnd((H, INTER))); w2.append(rnd((INTER, H)))
    wqkv = jnp.stack([jnp.concatenate([a, b, c], axis=1)
                      for a, b, c in zip(wq, wk, wv)])                   # (L, H, 3H)
    mlm_w = rnd((H, H))

    # packed per-layer small vectors: rows = [bq,bk,bv,bo,ln1g,ln1b,b1,b2,ln2g,ln2b]
    lrows = []
    for _ in range(NUM_LAYERS):
        rows = [rnd((1, H)), rnd((1, H)), rnd((1, H)), rnd((1, H)),
                1.0 + rnd((1, H)), rnd((1, H)),
                rnd((1, INTER)), rnd((1, H)),
                1.0 + rnd((1, H)), rnd((1, H))]
        lrows.append(jnp.concatenate(rows, axis=0))
    layer_vecs = jnp.stack(lrows)                                        # (L, 10, 128)

    # packed globals: [emb_ln_g, emb_ln_b, mlm_b, mlm_ln_g, mlm_ln_b, dec_b, head_mask...]
    global_vecs = jnp.concatenate([
        1.0 + rnd((1, H)), rnd((1, H)),
        rnd((1, H)), 1.0 + rnd((1, H)), rnd((1, H)),
        rnd((1, V)),
        head_mask,
    ], axis=0)                                                           # (6+NH, 128)

    word_emb_bf16 = word_emb.astype(jnp.bfloat16)
    return {
        "word_emb": word_emb_bf16,               # (V, H) bf16, used by one-hot gather
        "pos_type_emb": pos_type,                # (T, H) f32
        "attn_bias": attn_bias,                  # (T, NT) f32
        "seg_ones": seg_ones,                    # (NT, NT) f32
        "wqkv": wqkv.astype(jnp.bfloat16),       # (L, H, 3H)
        "wo": jnp.stack(wo).astype(jnp.bfloat16),
        "w1": jnp.stack(w1).astype(jnp.bfloat16),
        "w2": jnp.stack(w2).astype(jnp.bfloat16),
        "mlm_w": mlm_w.astype(jnp.bfloat16),
        "dec_wT": word_emb_bf16.T,               # tied decoder weights (H, V)
        "layer_vecs": layer_vecs,
        "global_vecs": global_vecs,
    }


# ---------------- pure-JAX reference (mirrors the PyTorch forward) ----------------
def cloze_reference(token_ids, option_ids, params):
    lv = params["layer_vecs"]
    gv = params["global_vecs"]
    word = params["word_emb"].astype(jnp.float32)
    emb = word[token_ids].reshape(T, H) + params["pos_type_emb"]
    x = _layernorm(emb, gv[_EG], gv[_EB])
    for l in range(NUM_LAYERS):
        wqkv = params["wqkv"][l].astype(jnp.float32)
        q = x @ wqkv[:, :H] + lv[l, _BQ]
        k = x @ wqkv[:, H:2 * H] + lv[l, _BK]
        v = x @ wqkv[:, 2 * H:] + lv[l, _BV]
        ctx = jnp.zeros_like(x)
        for b in range(B):
            rows = slice(b * S, (b + 1) * S)
            for h in range(NUM_HEADS):
                cols = slice(h * HEAD_DIM, (h + 1) * HEAD_DIM)
                sc = (q[rows, cols] @ k[rows, cols].T) / jnp.sqrt(jnp.float32(HEAD_DIM))
                pr = jax.nn.softmax(sc, axis=-1)
                ctx = ctx.at[rows, cols].set(pr @ v[rows, cols])
        attn = ctx @ params["wo"][l].astype(jnp.float32) + lv[l, _BO]
        h1 = _layernorm(x + attn, lv[l, _L1G], lv[l, _L1B])
        ff = _gelu(h1 @ params["w1"][l].astype(jnp.float32) + lv[l, _B1])
        ff = ff @ params["w2"][l].astype(jnp.float32) + lv[l, _B2]
        x = _layernorm(h1 + ff, lv[l, _L2G], lv[l, _L2B])
    hh = _gelu(x @ params["mlm_w"].astype(jnp.float32) + gv[_MB])
    hh = _layernorm(hh, gv[_MG], gv[_MBETA])
    logits = (hh @ params["dec_wT"].astype(jnp.float32) + gv[_DB]).reshape(B, S, V)
    bidx, tidx = jnp.nonzero(token_ids == MASK_ID, size=NUM_MASKS)
    return logits[bidx[:, None, None], tidx[:, None, None], option_ids].max(-1)


# ---------------- demo ----------------
if __name__ == "__main__":
    key = jax.random.PRNGKey(0)
    k_tok, k_opt, k_par = jax.random.split(key, 3)

    token_ids = jax.random.randint(k_tok, (B, S), 0, 100, dtype=jnp.int32)
    token_ids = token_ids.at[0, 3].set(MASK_ID)
    token_ids = token_ids.at[1, 5].set(MASK_ID)
    option_ids = jax.random.randint(k_opt, (NUM_OPTIONS, OPT_SUBTOKENS), 0, V,
                                    dtype=jnp.int32)

    params = init_params(k_par)

    out = cloze_forward(token_ids, option_ids, params)
    jax.block_until_ready(out)
    assert out.shape == (NUM_MASKS, NUM_OPTIONS) and out.dtype == jnp.float32

    ref = cloze_reference(token_ids, option_ids, params)
    assert jnp.allclose(out, ref, atol=5e-2, rtol=5e-2), (out, ref)
    print("KERNEL_OK")
</pallas_src>

<mosaic_0001>
module attributes {stable_mosaic.version = 11 : i64} {
  func.func private @main(%arg0: i32) attributes {dimension_semantics = [#tpu.dimension_semantics<core_parallel>], iteration_bounds = array<i64: 2>, tpu.core_type = #tpu.core_type<sc_scalar_subcore>, window_params = []} {
    return
  }
}

module attributes {stable_mosaic.version = 11 : i64} {
  func.func private @main(%arg0: i32) attributes {dimension_semantics = [#tpu.dimension_semantics<core_parallel>], iteration_bounds = array<i64: 2>, tpu.core_type = #tpu.core_type<sc_scalar_subcore>, window_params = []} {
    return
  }
}

module attributes {stable_mosaic.version = 11 : i64} {
  func.func @fused_cloze_kernel(%arg0: memref<2xi32, #tpu.memory_space<smem>>, %arg1: memref<12xi32, #tpu.memory_space<smem>>, %arg2: memref<16x1xi32, #tpu.memory_space<vmem>>, %arg3: memref<128x128xbf16, #tpu.memory_space<vmem>>, %arg4: memref<16x128xf32, #tpu.memory_space<vmem>>, %arg5: memref<16x64xf32, #tpu.memory_space<vmem>>, %arg6: memref<64x64xf32, #tpu.memory_space<vmem>>, %arg7: memref<2x128x384xbf16, #tpu.memory_space<vmem>>, %arg8: memref<2x128x128xbf16, #tpu.memory_space<vmem>>, %arg9: memref<2x128x128xbf16, #tpu.memory_space<vmem>>, %arg10: memref<2x128x128xbf16, #tpu.memory_space<vmem>>, %arg11: memref<128x128xbf16, #tpu.memory_space<vmem>>, %arg12: memref<128x128xbf16, #tpu.memory_space<vmem>>, %arg13: memref<2x10x128xf32, #tpu.memory_space<vmem>>, %arg14: memref<10x128xf32, #tpu.memory_space<vmem>>, %arg15: memref<2x4xf32, #tpu.memory_space<vmem>>, %arg16: memref<16x128xf32, #tpu.memory_space<vmem>>) attributes {dimension_semantics = [], scalar_prefetch = 0 : i64, scratch_operands = 1 : i64, tpu.core_type = #tpu.core_type<tc>} {
    %c0 = arith.constant 0 : index
    %c0_0 = arith.constant 0 : index
    %0 = vector.load %arg14[%c0, %c0_0] : memref<10x128xf32, #tpu.memory_space<vmem>>, vector<10x128xf32>
    %1 = tpu.iota {dimensions = array<i32: 1>} : vector<16x128xi32>
    %c0_1 = arith.constant 0 : index
    %c0_2 = arith.constant 0 : index
    %2 = vector.load %arg2[%c0_1, %c0_2] : memref<16x1xi32, #tpu.memory_space<vmem>>, vector<16x1xi32>
    %3 = vector.broadcast %2 : vector<16x1xi32> to vector<16x128xi32>
    %4 = arith.cmpi eq, %1, %3 : vector<16x128xi32>
    %cst = arith.constant 1.000000e+00 : f32
    %cst_3 = arith.constant 0.000000e+00 : f32
    %5 = vector.broadcast %cst : f32 to vector<16x128xf32>
    %6 = vector.broadcast %cst_3 : f32 to vector<16x128xf32>
    %7 = arith.select %4, %5, %6 : vector<16x128xi1>, vector<16x128xf32>
    %8 = arith.truncf %7 : vector<16x128xf32> to vector<16x128xbf16>
    %c0_4 = arith.constant 0 : index
    %c0_5 = arith.constant 0 : index
    %9 = vector.load %arg3[%c0_4, %c0_5] : memref<128x128xbf16, #tpu.memory_space<vmem>>, vector<128x128xbf16>
    %cst_6 = arith.constant dense<0.000000e+00> : vector<16x128xf32>
    %10 = tpu.matmul %8, %9, %cst_6 {dimension_numbers = #tpu.dot_dimension_numbers<[1], [0], [0], [1], [0, 0, 1, 1], [], []>} : vector<16x128xbf16>, vector<128x128xbf16>, vector<16x128xf32> -> vector<16x128xf32>
    %c0_7 = arith.constant 0 : index
    %c0_8 = arith.constant 0 : index
    %11 = vector.load %arg4[%c0_7, %c0_8] : memref<16x128xf32, #tpu.memory_space<vmem>>, vector<16x128xf32>
    %12 = arith.addf %10, %11 : vector<16x128xf32>
    %13 = vector.extract_strided_slice %0 {offsets = [0, 0], sizes = [1, 128], strides = [1, 1]} : vector<10x128xf32> to vector<1x128xf32>
    %14 = vector.extract_strided_slice %0 {offsets = [1, 0], sizes = [1, 128], strides = [1, 1]} : vector<10x128xf32> to vector<1x128xf32>
    %cst_9 = arith.constant dense<0.000000e+00> : vector<16xf32>
    %15 = vector.multi_reduction <add>, %12, %cst_9 [1] : vector<16x128xf32> to vector<16xf32>
    %16 = vector.shape_cast %15 : vector<16xf32> to vector<16x1xf32>
    %cst_10 = arith.constant 1.280000e+02 : f32
    %17 = vector.broadcast %cst_10 : f32 to vector<16x1xf32>
    %18 = arith.divf %16, %17 : vector<16x1xf32>
    %19 = vector.broadcast %18 : vector<16x1xf32> to vector<16x128xf32>
    %20 = arith.subf %12, %19 : vector<16x128xf32>
    %21 = arith.mulf %20, %20 : vector<16x128xf32>
    %cst_11 = arith.constant dense<0.000000e+00> : vector<16xf32>
    %22 = vector.multi_reduction <add>, %21, %cst_11 [1] : vector<16x128xf32> to vector<16xf32>
    %23 = vector.shape_cast %22 : vector<16xf32> to vector<16x1xf32>
    %cst_12 = arith.constant 1.280000e+02 : f32
    %24 = vector.broadcast %cst_12 : f32 to vector<16x1xf32>
    %25 = arith.divf %23, %24 : vector<16x1xf32>
    %26 = vector.broadcast %18 : vector<16x1xf32> to vector<16x128xf32>
    %27 = arith.subf %12, %26 : vector<16x128xf32>
    %cst_13 = arith.constant 9.99999996E-13 : f32
    %28 = vector.broadcast %cst_13 : f32 to vector<16x1xf32>
    %29 = arith.addf %25, %28 : vector<16x1xf32>
    %30 = math.rsqrt %29 : vector<16x1xf32>
    %31 = vector.broadcast %30 : vector<16x1xf32> to vector<16x128xf32>
    %32 = arith.mulf %27, %31 : vector<16x128xf32>
    %33 = vector.broadcast %13 : vector<1x128xf32> to vector<16x128xf32>
    %34 = arith.mulf %32, %33 : vector<16x128xf32>
    %35 = vector.broadcast %14 : vector<1x128xf32> to vector<16x128xf32>
    %36 = arith.addf %34, %35 : vector<16x128xf32>
    %37 = vector.extract_strided_slice %0 {offsets = [6, 0], sizes = [4, 128], strides = [1, 1]} : vector<10x128xf32> to vector<4x128xf32>
    %c0_14 = arith.constant 0 : index
    %c0_15 = arith.constant 0 : index
    %38 = vector.load %arg5[%c0_14, %c0_15] : memref<16x64xf32, #tpu.memory_space<vmem>>, vector<16x64xf32>
    %c0_16 = arith.constant 0 : index
    %c0_17 = arith.constant 0 : index
    %39 = vector.load %arg6[%c0_16, %c0_17] : memref<64x64xf32, #tpu.memory_space<vmem>>, vector<64x64xf32>
    %c0_18 = arith.constant 0 : index
    %c0_19 = arith.constant 0 : index
    %c0_20 = arith.constant 0 : index
    %40 = vector.load %arg13[%c0_18, %c0_19, %c0_20] : memref<2x10x128xf32, #tpu.memory_space<vmem>>, vector<1x10x128xf32>
    %41 = vector.shape_cast %40 : vector<1x10x128xf32> to vector<10x128xf32>
    %42 = arith.truncf %36 : vector<16x128xf32> to vector<16x128xbf16>
    %c0_21 = arith.constant 0 : index
    %c0_22 = arith.constant 0 : index
    %c0_23 = arith.constant 0 : index
    %43 = vector.load %arg7[%c0_21, %c0_22, %c0_23] : memref<2x128x384xbf16, #tpu.memory_space<vmem>>, vector<1x128x384xbf16>
    %44 = vector.shape_cast %43 : vector<1x128x384xbf16> to vector<128x384xbf16>
    %cst_24 = arith.constant dense<0.000000e+00> : vector<16x384xf32>
    %45 = tpu.matmul %42, %44, %cst_24 {dimension_numbers = #tpu.dot_dimension_numbers<[1], [0], [0], [1], [0, 0, 1, 1], [], []>} : vector<16x128xbf16>, vector<128x384xbf16>, vector<16x384xf32> -> vector<16x384xf32>
    %46 = vector.extract_strided_slice %45 {offsets = [0, 0], sizes = [16, 128], strides = [1, 1]} : vector<16x384xf32> to vector<16x128xf32>
    %47 = vector.extract_strided_slice %41 {offsets = [0, 0], sizes = [1, 128], strides = [1, 1]} : vector<10x128xf32> to vector<1x128xf32>
    %48 = vector.broadcast %47 : vector<1x128xf32> to vector<16x128xf32>
    %49 = arith.addf %46, %48 : vector<16x128xf32>
    %cst_25 = arith.constant 0.176776692 : f32
    %50 = vector.broadcast %cst_25 : f32 to vector<16x128xf32>
    %51 = arith.mulf %49, %50 : vector<16x128xf32>
    %52 = vector.extract_strided_slice %45 {offsets = [0, 128], sizes = [16, 128], strides = [1, 1]} : vector<16x384xf32> to vector<16x128xf32>
    %53 = vector.extract_strided_slice %41 {offsets = [1, 0], sizes = [1, 128], strides = [1, 1]} : vector<10x128xf32> to vector<1x128xf32>
    %54 = vector.broadcast %53 : vector<1x128xf32> to vector<16x128xf32>
    %55 = arith.addf %52, %54 : vector<16x128xf32>
    %56 = vector.extract_strided_slice %45 {offsets = [0, 256], sizes = [16, 128], strides = [1, 1]} : vector<16x384xf32> to vector<16x128xf32>
    %57 = vector.extract_strided_slice %41 {offsets = [2, 0], sizes = [1, 128], strides = [1, 1]} : vector<10x128xf32> to vector<1x128xf32>
    %58 = vector.broadcast %57 : vector<1x128xf32> to vector<16x128xf32>
    %59 = arith.addf %56, %58 : vector<16x128xf32>
    %60 = vector.extract_strided_slice %37 {offsets = [0, 0], sizes = [1, 128], strides = [1, 1]} : vector<4x128xf32> to vector<1x128xf32>
    %61 = vector.broadcast %60 : vector<1x128xf32> to vector<16x128xf32>
    %62 = arith.mulf %55, %61 : vector<16x128xf32>
    %63 = vector.extract_strided_slice %37 {offsets = [1, 0], sizes = [1, 128], strides = [1, 1]} : vector<4x128xf32> to vector<1x128xf32>
    %64 = vector.broadcast %63 : vector<1x128xf32> to vector<16x128xf32>
    %65 = arith.mulf %55, %64 : vector<16x128xf32>
    %66 = vector.extract_strided_slice %37 {offsets = [2, 0], sizes = [1, 128], strides = [1, 1]} : vector<4x128xf32> to vector<1x128xf32>
    %67 = vector.broadcast %66 : vector<1x128xf32> to vector<16x128xf32>
    %68 = arith.mulf %55, %67 : vector<16x128xf32>
    %69 = vector.extract_strided_slice %37 {offsets = [3, 0], sizes = [1, 128], strides = [1, 1]} : vector<4x128xf32> to vector<1x128xf32>
    %70 = vector.broadcast %69 : vector<1x128xf32> to vector<16x128xf32>
    %71 = arith.mulf %55, %70 : vector<16x128xf32>
    %72 = tpu.concatenate %62, %65, %68, %71 in 0 : vector<16x128xf32>, vector<16x128xf32>, vector<16x128xf32>, vector<16x128xf32> -> vector<64x128xf32>
    %73 = vector.extract_strided_slice %37 {offsets = [0, 0], sizes = [1, 128], strides = [1, 1]} : vector<4x128xf32> to vector<1x128xf32>
    %74 = vector.broadcast %73 : vector<1x128xf32> to vector<16x128xf32>
    %75 = arith.mulf %59, %74 : vector<16x128xf32>
    %76 = vector.extract_strided_slice %37 {offsets = [1, 0], sizes = [1, 128], strides = [1, 1]} : vector<4x128xf32> to vector<1x128xf32>
    %77 = vector.broadcast %76 : vector<1x128xf32> to vector<16x128xf32>
    %78 = arith.mulf %59, %77 : vector<16x128xf32>
    %79 = vector.extract_strided_slice %37 {offsets = [2, 0], sizes = [1, 128], strides = [1, 1]} : vector<4x128xf32> to vector<1x128xf32>
    %80 = vector.broadcast %79 : vector<1x128xf32> to vector<16x128xf32>
    %81 = arith.mulf %59, %80 : vector<16x128xf32>
    %82 = vector.extract_strided_slice %37 {offsets = [3, 0], sizes = [1, 128], strides = [1, 1]} : vector<4x128xf32> to vector<1x128xf32>
    %83 = vector.broadcast %82 : vector<1x128xf32> to vector<16x128xf32>
    %84 = arith.mulf %59, %83 : vector<16x128xf32>
    %85 = tpu.concatenate %75, %78, %81, %84 in 0 : vector<16x128xf32>, vector<16x128xf32>, vector<16x128xf32>, vector<16x128xf32> -> vector<64x128xf32>
    %86 = arith.truncf %51 : vector<16x128xf32> to vector<16x128xbf16>
    %87 = tpu.transpose %72, [1, 0] : vector<64x128xf32> -> vector<128x64xf32>
    %88 = arith.truncf %87 : vector<128x64xf32> to vector<128x64xbf16>
    %cst_26 = arith.constant dense<0.000000e+00> : vector<16x64xf32>
    %89 = tpu.matmul %86, %88, %cst_26 {dimension_numbers = #tpu.dot_dimension_numbers<[1], [0], [0], [1], [0, 0, 1, 1], [], []>} : vector<16x128xbf16>, vector<128x64xbf16>, vector<16x64xf32> -> vector<16x64xf32>
    %90 = arith.addf %89, %38 : vector<16x64xf32>
    %cst_27 = arith.constant dense<0xFF800000> : vector<16xf32>
    %91 = vector.multi_reduction <maximumf>, %90, %cst_27 [1] : vector<16x64xf32> to vector<16xf32>
    %92 = vector.shape_cast %91 : vector<16xf32> to vector<16x1xf32>
    %93 = vector.broadcast %92 : vector<16x1xf32> to vector<16x64xf32>
    %94 = arith.subf %90, %93 : vector<16x64xf32>
    %95 = math.exp %94 : vector<16x64xf32>
    %cst_28 = arith.constant dense<0.000000e+00> : vector<16x64xf32>
    %96 = tpu.matmul %95, %39, %cst_28 {dimension_numbers = #tpu.dot_dimension_numbers<[1], [0], [0], [1], [0, 0, 1, 1], [], []>} : vector<16x64xf32>, vector<64x64xf32>, vector<16x64xf32> -> vector<16x64xf32>
    %97 = tpu.reciprocal %96 {approx = true} : vector<16x64xf32> -> vector<16x64xf32>
    %98 = arith.mulf %95, %97 : vector<16x64xf32>
    %99 = arith.truncf %98 : vector<16x64xf32> to vector<16x64xbf16>
    %100 = arith.truncf %85 : vector<64x128xf32> to vector<64x128xbf16>
    %cst_29 = arith.constant dense<0.000000e+00> : vector<16x128xf32>
    %101 = tpu.matmul %99, %100, %cst_29 {dimension_numbers = #tpu.dot_dimension_numbers<[1], [0], [0], [1], [0, 0, 1, 1], [], []>} : vector<16x64xbf16>, vector<64x128xbf16>, vector<16x128xf32> -> vector<16x128xf32>
    %102 = arith.truncf %101 : vector<16x128xf32> to vector<16x128xbf16>
    %c0_30 = arith.constant 0 : index
    %c0_31 = arith.constant 0 : index
    %c0_32 = arith.constant 0 : index
    %103 = vector.load %arg8[%c0_30, %c0_31, %c0_32] : memref<2x128x128xbf16, #tpu.memory_space<vmem>>, vector<1x128x128xbf16>
    %104 = vector.shape_cast %103 : vector<1x128x128xbf16> to vector<128x128xbf16>
    %cst_33 = arith.constant dense<0.000000e+00> : vector<16x128xf32>
    %105 = tpu.matmul %102, %104, %cst_33 {dimension_numbers = #tpu.dot_dimension_numbers<[1], [0], [0], [1], [0, 0, 1, 1], [], []>} : vector<16x128xbf16>, vector<128x128xbf16>, vector<16x128xf32> -> vector<16x128xf32>
    %106 = vector.extract_strided_slice %41 {offsets = [3, 0], sizes = [1, 128], strides = [1, 1]} : vector<10x128xf32> to vector<1x128xf32>
    %107 = vector.broadcast %106 : vector<1x128xf32> to vector<16x128xf32>
    %108 = arith.addf %105, %107 : vector<16x128xf32>
    %109 = arith.addf %36, %108 : vector<16x128xf32>
    %110 = vector.extract_strided_slice %41 {offsets = [4, 0], sizes = [1, 128], strides = [1, 1]} : vector<10x128xf32> to vector<1x128xf32>
    %111 = vector.extract_strided_slice %41 {offsets = [5, 0], sizes = [1, 128], strides = [1, 1]} : vector<10x128xf32> to vector<1x128xf32>
    %cst_34 = arith.constant dense<0.000000e+00> : vector<16xf32>
    %112 = vector.multi_reduction <add>, %109, %cst_34 [1] : vector<16x128xf32> to vector<16xf32>
    %113 = vector.shape_cast %112 : vector<16xf32> to vector<16x1xf32>
    %cst_35 = arith.constant 1.280000e+02 : f32
    %114 = vector.broadcast %cst_35 : f32 to vector<16x1xf32>
    %115 = arith.divf %113, %114 : vector<16x1xf32>
    %116 = vector.broadcast %115 : vector<16x1xf32> to vector<16x128xf32>
    %117 = arith.subf %109, %116 : vector<16x128xf32>
    %118 = arith.mulf %117, %117 : vector<16x128xf32>
    %cst_36 = arith.constant dense<0.000000e+00> : vector<16xf32>
    %119 = vector.multi_reduction <add>, %118, %cst_36 [1] : vector<16x128xf32> to vector<16xf32>
    %120 = vector.shape_cast %119 : vector<16xf32> to vector<16x1xf32>
    %cst_37 = arith.constant 1.280000e+02 : f32
    %121 = vector.broadcast %cst_37 : f32 to vector<16x1xf32>
    %122 = arith.divf %120, %121 : vector<16x1xf32>
    %123 = vector.broadcast %115 : vector<16x1xf32> to vector<16x128xf32>
    %124 = arith.subf %109, %123 : vector<16x128xf32>
    %cst_38 = arith.constant 9.99999996E-13 : f32
    %125 = vector.broadcast %cst_38 : f32 to vector<16x1xf32>
    %126 = arith.addf %122, %125 : vector<16x1xf32>
    %127 = math.rsqrt %126 : vector<16x1xf32>
    %128 = vector.broadcast %127 : vector<16x1xf32> to vector<16x128xf32>
    %129 = arith.mulf %124, %128 : vector<16x128xf32>
    %130 = vector.broadcast %110 : vector<1x128xf32> to vector<16x128xf32>
    %131 = arith.mulf %129, %130 : vector<16x128xf32>
    %132 = vector.broadcast %111 : vector<1x128xf32> to vector<16x128xf32>
    %133 = arith.addf %131, %132 : vector<16x128xf32>
    %134 = arith.truncf %133 : vector<16x128xf32> to vector<16x128xbf16>
    %c0_39 = arith.constant 0 : index
    %c0_40 = arith.constant 0 : index
    %c0_41 = arith.constant 0 : index
    %135 = vector.load %arg9[%c0_39, %c0_40, %c0_41] : memref<2x128x128xbf16, #tpu.memory_space<vmem>>, vector<1x128x128xbf16>
    %136 = vector.shape_cast %135 : vector<1x128x128xbf16> to vector<128x128xbf16>
    %cst_42 = arith.constant dense<0.000000e+00> : vector<16x128xf32>
    %137 = tpu.matmul %134, %136, %cst_42 {dimension_numbers = #tpu.dot_dimension_numbers<[1], [0], [0], [1], [0, 0, 1, 1], [], []>} : vector<16x128xbf16>, vector<128x128xbf16>, vector<16x128xf32> -> vector<16x128xf32>
    %138 = vector.extract_strided_slice %41 {offsets = [6, 0], sizes = [1, 128], strides = [1, 1]} : vector<10x128xf32> to vector<1x128xf32>
    %139 = vector.broadcast %138 : vector<1x128xf32> to vector<16x128xf32>
    %140 = arith.addf %137, %139 : vector<16x128xf32>
    %cst_43 = arith.constant 5.000000e-01 : f32
    %141 = vector.broadcast %cst_43 : f32 to vector<16x128xf32>
    %142 = arith.mulf %141, %140 : vector<16x128xf32>
    %cst_44 = arith.constant 4.471500e-02 : f32
    %143 = vector.broadcast %cst_44 : f32 to vector<16x128xf32>
    %144 = arith.mulf %143, %140 : vector<16x128xf32>
    %145 = arith.mulf %144, %140 : vector<16x128xf32>
    %146 = arith.mulf %145, %140 : vector<16x128xf32>
    %147 = arith.addf %140, %146 : vector<16x128xf32>
    %cst_45 = arith.constant 0.797884583 : f32
    %148 = vector.broadcast %cst_45 : f32 to vector<16x128xf32>
    %149 = arith.mulf %148, %147 : vector<16x128xf32>
    %150 = math.tanh %149 : vector<16x128xf32>
    %cst_46 = arith.constant 1.000000e+00 : f32
    %151 = vector.broadcast %cst_46 : f32 to vector<16x128xf32>
    %152 = arith.addf %151, %150 : vector<16x128xf32>
    %153 = arith.mulf %142, %152 : vector<16x128xf32>
    %154 = arith.truncf %153 : vector<16x128xf32> to vector<16x128xbf16>
    %c0_47 = arith.constant 0 : index
    %c0_48 = arith.constant 0 : index
    %c0_49 = arith.constant 0 : index
    %155 = vector.load %arg10[%c0_47, %c0_48, %c0_49] : memref<2x128x128xbf16, #tpu.memory_space<vmem>>, vector<1x128x128xbf16>
    %156 = vector.shape_cast %155 : vector<1x128x128xbf16> to vector<128x128xbf16>
    %cst_50 = arith.constant dense<0.000000e+00> : vector<16x128xf32>
    %157 = tpu.matmul %154, %156, %cst_50 {dimension_numbers = #tpu.dot_dimension_numbers<[1], [0], [0], [1], [0, 0, 1, 1], [], []>} : vector<16x128xbf16>, vector<128x128xbf16>, vector<16x128xf32> -> vector<16x128xf32>
    %158 = vector.extract_strided_slice %41 {offsets = [7, 0], sizes = [1, 128], strides = [1, 1]} : vector<10x128xf32> to vector<1x128xf32>
    %159 = vector.broadcast %158 : vector<1x128xf32> to vector<16x128xf32>
    %160 = arith.addf %157, %159 : vector<16x128xf32>
    %161 = arith.addf %133, %160 : vector<16x128xf32>
    %162 = vector.extract_strided_slice %41 {offsets = [8, 0], sizes = [1, 128], strides = [1, 1]} : vector<10x128xf32> to vector<1x128xf32>
    %163 = vector.extract_strided_slice %41 {offsets = [9, 0], sizes = [1, 128], strides = [1, 1]} : vector<10x128xf32> to vector<1x128xf32>
    %cst_51 = arith.constant dense<0.000000e+00> : vector<16xf32>
    %164 = vector.multi_reduction <add>, %161, %cst_51 [1] : vector<16x128xf32> to vector<16xf32>
    %165 = vector.shape_cast %164 : vector<16xf32> to vector<16x1xf32>
    %cst_52 = arith.constant 1.280000e+02 : f32
    %166 = vector.broadcast %cst_52 : f32 to vector<16x1xf32>
    %167 = arith.divf %165, %166 : vector<16x1xf32>
    %168 = vector.broadcast %167 : vector<16x1xf32> to vector<16x128xf32>
    %169 = arith.subf %161, %168 : vector<16x128xf32>
    %170 = arith.mulf %169, %169 : vector<16x128xf32>
    %cst_53 = arith.constant dense<0.000000e+00> : vector<16xf32>
    %171 = vector.multi_reduction <add>, %170, %cst_53 [1] : vector<16x128xf32> to vector<16xf32>
    %172 = vector.shape_cast %171 : vector<16xf32> to vector<16x1xf32>
    %cst_54 = arith.constant 1.280000e+02 : f32
    %173 = vector.broadcast %cst_54 : f32 to vector<16x1xf32>
    %174 = arith.divf %172, %173 : vector<16x1xf32>
    %175 = vector.broadcast %167 : vector<16x1xf32> to vector<16x128xf32>
    %176 = arith.subf %161, %175 : vector<16x128xf32>
    %cst_55 = arith.constant 9.99999996E-13 : f32
    %177 = vector.broadcast %cst_55 : f32 to vector<16x1xf32>
    %178 = arith.addf %174, %177 : vector<16x1xf32>
    %179 = math.rsqrt %178 : vector<16x1xf32>
    %180 = vector.broadcast %179 : vector<16x1xf32> to vector<16x128xf32>
    %181 = arith.mulf %176, %180 : vector<16x128xf32>
    %182 = vector.broadcast %162 : vector<1x128xf32> to vector<16x128xf32>
    %183 = arith.mulf %181, %182 : vector<16x128xf32>
    %184 = vector.broadcast %163 : vector<1x128xf32> to vector<16x128xf32>
    %185 = arith.addf %183, %184 : vector<16x128xf32>
    %c1 = arith.constant 1 : index
    %c0_56 = arith.constant 0 : index
    %c0_57 = arith.constant 0 : index
    %186 = vector.load %arg13[%c1, %c0_56, %c0_57] : memref<2x10x128xf32, #tpu.memory_space<vmem>>, vector<1x10x128xf32>
    %187 = vector.shape_cast %186 : vector<1x10x128xf32> to vector<10x128xf32>
    %188 = arith.truncf %185 : vector<16x128xf32> to vector<16x128xbf16>
    %c1_58 = arith.constant 1 : index
    %c0_59 = arith.constant 0 : index
    %c0_60 = arith.constant 0 : index
    %189 = vector.load %arg7[%c1_58, %c0_59, %c0_60] : memref<2x128x384xbf16, #tpu.memory_space<vmem>>, vector<1x128x384xbf16>
    %190 = vector.shape_cast %189 : vector<1x128x384xbf16> to vector<128x384xbf16>
    %cst_61 = arith.constant dense<0.000000e+00> : vector<16x384xf32>
    %191 = tpu.matmul %188, %190, %cst_61 {dimension_numbers = #tpu.dot_dimension_numbers<[1], [0], [0], [1], [0, 0, 1, 1], [], []>} : vector<16x128xbf16>, vector<128x384xbf16>, vector<16x384xf32> -> vector<16x384xf32>
    %192 = vector.extract_strided_slice %191 {offsets = [0, 0], sizes = [16, 128], strides = [1, 1]} : vector<16x384xf32> to vector<16x128xf32>
    %193 = vector.extract_strided_slice %187 {offsets = [0, 0], sizes = [1, 128], strides = [1, 1]} : vector<10x128xf32> to vector<1x128xf32>
    %194 = vector.broadcast %193 : vector<1x128xf32> to vector<16x128xf32>
    %195 = arith.addf %192, %194 : vector<16x128xf32>
    %cst_62 = arith.constant 0.176776692 : f32
    %196 = vector.broadcast %cst_62 : f32 to vector<16x128xf32>
    %197 = arith.mulf %195, %196 : vector<16x128xf32>
    %198 = vector.extract_strided_slice %191 {offsets = [0, 128], sizes = [16, 128], strides = [1, 1]} : vector<16x384xf32> to vector<16x128xf32>
    %199 = vector.extract_strided_slice %187 {offsets = [1, 0], sizes = [1, 128], strides = [1, 1]} : vector<10x128xf32> to vector<1x128xf32>
    %200 = vector.broadcast %199 : vector<1x128xf32> to vector<16x128xf32>
    %201 = arith.addf %198, %200 : vector<16x128xf32>
    %202 = vector.extract_strided_slice %191 {offsets = [0, 256], sizes = [16, 128], strides = [1, 1]} : vector<16x384xf32> to vector<16x128xf32>
    %203 = vector.extract_strided_slice %187 {offsets = [2, 0], sizes = [1, 128], strides = [1, 1]} : vector<10x128xf32> to vector<1x128xf32>
    %204 = vector.broadcast %203 : vector<1x128xf32> to vector<16x128xf32>
    %205 = arith.addf %202, %204 : vector<16x128xf32>
    %206 = vector.extract_strided_slice %37 {offsets = [0, 0], sizes = [1, 128], strides = [1, 1]} : vector<4x128xf32> to vector<1x128xf32>
    %207 = vector.broadcast %206 : vector<1x128xf32> to vector<16x128xf32>
    %208 = arith.mulf %201, %207 : vector<16x128xf32>
    %209 = vector.extract_strided_slice %37 {offsets = [1, 0], sizes = [1, 128], strides = [1, 1]} : vector<4x128xf32> to vector<1x128xf32>
    %210 = vector.broadcast %209 : vector<1x128xf32> to vector<16x128xf32>
    %211 = arith.mulf %201, %210 : vector<16x128xf32>
    %212 = vector.extract_strided_slice %37 {offsets = [2, 0], sizes = [1, 128], strides = [1, 1]} : vector<4x128xf32> to vector<1x128xf32>
    %213 = vector.broadcast %212 : vector<1x128xf32> to vector<16x128xf32>
    %214 = arith.mulf %201, %213 : vector<16x128xf32>
    %215 = vector.extract_strided_slice %37 {offsets = [3, 0], sizes = [1, 128], strides = [1, 1]} : vector<4x128xf32> to vector<1x128xf32>
    %216 = vector.broadcast %215 : vector<1x128xf32> to vector<16x128xf32>
    %217 = arith.mulf %201, %216 : vector<16x128xf32>
    %218 = tpu.concatenate %208, %211, %214, %217 in 0 : vector<16x128xf32>, vector<16x128xf32>, vector<16x128xf32>, vector<16x128xf32> -> vector<64x128xf32>
    %219 = vector.extract_strided_slice %37 {offsets = [0, 0], sizes = [1, 128], strides = [1, 1]} : vector<4x128xf32> to vector<1x128xf32>
    %220 = vector.broadcast %219 : vector<1x128xf32> to vector<16x128xf32>
    %221 = arith.mulf %205, %220 : vector<16x128xf32>
    %222 = vector.extract_strided_slice %37 {offsets = [1, 0], sizes = [1, 128], strides = [1, 1]} : vector<4x128xf32> to vector<1x128xf32>
    %223 = vector.broadcast %222 : vector<1x128xf32> to vector<16x128xf32>
    %224 = arith.mulf %205, %223 : vector<16x128xf32>
    %225 = vector.extract_strided_slice %37 {offsets = [2, 0], sizes = [1, 128], strides = [1, 1]} : vector<4x128xf32> to vector<1x128xf32>
    %226 = vector.broadcast %225 : vector<1x128xf32> to vector<16x128xf32>
    %227 = arith.mulf %205, %226 : vector<16x128xf32>
    %228 = vector.extract_strided_slice %37 {offsets = [3, 0], sizes = [1, 128], strides = [1, 1]} : vector<4x128xf32> to vector<1x128xf32>
    %229 = vector.broadcast %228 : vector<1x128xf32> to vector<16x128xf32>
    %230 = arith.mulf %205, %229 : vector<16x128xf32>
    %231 = tpu.concatenate %221, %224, %227, %230 in 0 : vector<16x128xf32>, vector<16x128xf32>, vector<16x128xf32>, vector<16x128xf32> -> vector<64x128xf32>
    %232 = arith.truncf %197 : vector<16x128xf32> to vector<16x128xbf16>
    %233 = tpu.transpose %218, [1, 0] : vector<64x128xf32> -> vector<128x64xf32>
    %234 = arith.truncf %233 : vector<128x64xf32> to vector<128x64xbf16>
    %cst_63 = arith.constant dense<0.000000e+00> : vector<16x64xf32>
    %235 = tpu.matmul %232, %234, %cst_63 {dimension_numbers = #tpu.dot_dimension_numbers<[1], [0], [0], [1], [0, 0, 1, 1], [], []>} : vector<16x128xbf16>, vector<128x64xbf16>, vector<16x64xf32> -> vector<16x64xf32>
    %236 = arith.addf %235, %38 : vector<16x64xf32>
    %cst_64 = arith.constant dense<0xFF800000> : vector<16xf32>
    %237 = vector.multi_reduction <maximumf>, %236, %cst_64 [1] : vector<16x64xf32> to vector<16xf32>
    %238 = vector.shape_cast %237 : vector<16xf32> to vector<16x1xf32>
    %239 = vector.broadcast %238 : vector<16x1xf32> to vector<16x64xf32>
    %240 = arith.subf %236, %239 : vector<16x64xf32>
    %241 = math.exp %240 : vector<16x64xf32>
    %cst_65 = arith.constant dense<0.000000e+00> : vector<16x64xf32>
    %242 = tpu.matmul %241, %39, %cst_65 {dimension_numbers = #tpu.dot_dimension_numbers<[1], [0], [0], [1], [0, 0, 1, 1], [], []>} : vector<16x64xf32>, vector<64x64xf32>, vector<16x64xf32> -> vector<16x64xf32>
    %243 = tpu.reciprocal %242 {approx = true} : vector<16x64xf32> -> vector<16x64xf32>
    %244 = arith.mulf %241, %243 : vector<16x64xf32>
    %245 = arith.truncf %244 : vector<16x64xf32> to vector<16x64xbf16>
    %246 = arith.truncf %231 : vector<64x128xf32> to vector<64x128xbf16>
    %cst_66 = arith.constant dense<0.000000e+00> : vector<16x128xf32>
    %247 = tpu.matmul %245, %246, %cst_66 {dimension_numbers = #tpu.dot_dimension_numbers<[1], [0], [0], [1], [0, 0, 1, 1], [], []>} : vector<16x64xbf16>, vector<64x128xbf16>, vector<16x128xf32> -> vector<16x128xf32>
    %248 = arith.truncf %247 : vector<16x128xf32> to vector<16x128xbf16>
    %c1_67 = arith.constant 1 : index
    %c0_68 = arith.constant 0 : index
    %c0_69 = arith.constant 0 : index
    %249 = vector.load %arg8[%c1_67, %c0_68, %c0_69] : memref<2x128x128xbf16, #tpu.memory_space<vmem>>, vector<1x128x128xbf16>
    %250 = vector.shape_cast %249 : vector<1x128x128xbf16> to vector<128x128xbf16>
    %cst_70 = arith.constant dense<0.000000e+00> : vector<16x128xf32>
    %251 = tpu.matmul %248, %250, %cst_70 {dimension_numbers = #tpu.dot_dimension_numbers<[1], [0], [0], [1], [0, 0, 1, 1], [], []>} : vector<16x128xbf16>, vector<128x128xbf16>, vector<16x128xf32> -> vector<16x128xf32>
    %252 = vector.extract_strided_slice %187 {offsets = [3, 0], sizes = [1, 128], strides = [1, 1]} : vector<10x128xf32> to vector<1x128xf32>
    %253 = vector.broadcast %252 : vector<1x128xf32> to vector<16x128xf32>
    %254 = arith.addf %251, %253 : vector<16x128xf32>
    %255 = arith.addf %185, %254 : vector<16x128xf32>
    %256 = vector.extract_strided_slice %187 {offsets = [4, 0], sizes = [1, 128], strides = [1, 1]} : vector<10x128xf32> to vector<1x128xf32>
    %257 = vector.extract_strided_slice %187 {offsets = [5, 0], sizes = [1, 128], strides = [1, 1]} : vector<10x128xf32> to vector<1x128xf32>
    %cst_71 = arith.constant dense<0.000000e+00> : vector<16xf32>
    %258 = vector.multi_reduction <add>, %255, %cst_71 [1] : vector<16x128xf32> to vector<16xf32>
    %259 = vector.shape_cast %258 : vector<16xf32> to vector<16x1xf32>
    %cst_72 = arith.constant 1.280000e+02 : f32
    %260 = vector.broadcast %cst_72 : f32 to vector<16x1xf32>
    %261 = arith.divf %259, %260 : vector<16x1xf32>
    %262 = vector.broadcast %261 : vector<16x1xf32> to vector<16x128xf32>
    %263 = arith.subf %255, %262 : vector<16x128xf32>
    %264 = arith.mulf %263, %263 : vector<16x128xf32>
    %cst_73 = arith.constant dense<0.000000e+00> : vector<16xf32>
    %265 = vector.multi_reduction <add>, %264, %cst_73 [1] : vector<16x128xf32> to vector<16xf32>
    %266 = vector.shape_cast %265 : vector<16xf32> to vector<16x1xf32>
    %cst_74 = arith.constant 1.280000e+02 : f32
    %267 = vector.broadcast %cst_74 : f32 to vector<16x1xf32>
    %268 = arith.divf %266, %267 : vector<16x1xf32>
    %269 = vector.broadcast %261 : vector<16x1xf32> to vector<16x128xf32>
    %270 = arith.subf %255, %269 : vector<16x128xf32>
    %cst_75 = arith.constant 9.99999996E-13 : f32
    %271 = vector.broadcast %cst_75 : f32 to vector<16x1xf32>
    %272 = arith.addf %268, %271 : vector<16x1xf32>
    %273 = math.rsqrt %272 : vector<16x1xf32>
    %274 = vector.broadcast %273 : vector<16x1xf32> to vector<16x128xf32>
    %275 = arith.mulf %270, %274 : vector<16x128xf32>
    %276 = vector.broadcast %256 : vector<1x128xf32> to vector<16x128xf32>
    %277 = arith.mulf %275, %276 : vector<16x128xf32>
    %278 = vector.broadcast %257 : vector<1x128xf32> to vector<16x128xf32>
    %279 = arith.addf %277, %278 : vector<16x128xf32>
    %280 = arith.truncf %279 : vector<16x128xf32> to vector<16x128xbf16>
    %c1_76 = arith.constant 1 : index
    %c0_77 = arith.constant 0 : index
    %c0_78 = arith.constant 0 : index
    %281 = vector.load %arg9[%c1_76, %c0_77, %c0_78] : memref<2x128x128xbf16, #tpu.memory_space<vmem>>, vector<1x128x128xbf16>
    %282 = vector.shape_cast %281 : vector<1x128x128xbf16> to vector<128x128xbf16>
    %cst_79 = arith.constant dense<0.000000e+00> : vector<16x128xf32>
    %283 = tpu.matmul %280, %282, %cst_79 {dimension_numbers = #tpu.dot_dimension_numbers<[1], [0], [0], [1], [0, 0, 1, 1], [], []>} : vector<16x128xbf16>, vector<128x128xbf16>, vector<16x128xf32> -> vector<16x128xf32>
    %284 = vector.extract_strided_slice %187 {offsets = [6, 0], sizes = [1, 128], strides = [1, 1]} : vector<10x128xf32> to vector<1x128xf32>
    %285 = vector.broadcast %284 : vector<1x128xf32> to vector<16x128xf32>
    %286 = arith.addf %283, %285 : vector<16x128xf32>
    %cst_80 = arith.constant 5.000000e-01 : f32
    %287 = vector.broadcast %cst_80 : f32 to vector<16x128xf32>
    %288 = arith.mulf %287, %286 : vector<16x128xf32>
    %cst_81 = arith.constant 4.471500e-02 : f32
    %289 = vector.broadcast %cst_81 : f32 to vector<16x128xf32>
    %290 = arith.mulf %289, %286 : vector<16x128xf32>
    %291 = arith.mulf %290, %286 : vector<16x128xf32>
    %292 = arith.mulf %291, %286 : vector<16x128xf32>
    %293 = arith.addf %286, %292 : vector<16x128xf32>
    %cst_82 = arith.constant 0.797884583 : f32
    %294 = vector.broadcast %cst_82 : f32 to vector<16x128xf32>
    %295 = arith.mulf %294, %293 : vector<16x128xf32>
    %296 = math.tanh %295 : vector<16x128xf32>
    %cst_83 = arith.constant 1.000000e+00 : f32
    %297 = vector.broadcast %cst_83 : f32 to vector<16x128xf32>
    %298 = arith.addf %297, %296 : vector<16x128xf32>
    %299 = arith.mulf %288, %298 : vector<16x128xf32>
    %300 = arith.truncf %299 : vector<16x128xf32> to vector<16x128xbf16>
    %c1_84 = arith.constant 1 : index
    %c0_85 = arith.constant 0 : index
    %c0_86 = arith.constant 0 : index
    %301 = vector.load %arg10[%c1_84, %c0_85, %c0_86] : memref<2x128x128xbf16, #tpu.memory_space<vmem>>, vector<1x128x128xbf16>
    %302 = vector.shape_cast %301 : vector<1x128x128xbf16> to vector<128x128xbf16>
    %cst_87 = arith.constant dense<0.000000e+00> : vector<16x128xf32>
    %303 = tpu.matmul %300, %302, %cst_87 {dimension_numbers = #tpu.dot_dimension_numbers<[1], [0], [0], [1], [0, 0, 1, 1], [], []>} : vector<16x128xbf16>, vector<128x128xbf16>, vector<16x128xf32> -> vector<16x128xf32>
    %304 = vector.extract_strided_slice %187 {offsets = [7, 0], sizes = [1, 128], strides = [1, 1]} : vector<10x128xf32> to vector<1x128xf32>
    %305 = vector.broadcast %304 : vector<1x128xf32> to vector<16x128xf32>
    %306 = arith.addf %303, %305 : vector<16x128xf32>
    %307 = arith.addf %279, %306 : vector<16x128xf32>
    %308 = vector.extract_strided_slice %187 {offsets = [8, 0], sizes = [1, 128], strides = [1, 1]} : vector<10x128xf32> to vector<1x128xf32>
    %309 = vector.extract_strided_slice %187 {offsets = [9, 0], sizes = [1, 128], strides = [1, 1]} : vector<10x128xf32> to vector<1x128xf32>
    %cst_88 = arith.constant dense<0.000000e+00> : vector<16xf32>
    %310 = vector.multi_reduction <add>, %307, %cst_88 [1] : vector<16x128xf32> to vector<16xf32>
    %311 = vector.shape_cast %310 : vector<16xf32> to vector<16x1xf32>
    %cst_89 = arith.constant 1.280000e+02 : f32
    %312 = vector.broadcast %cst_89 : f32 to vector<16x1xf32>
    %313 = arith.divf %311, %312 : vector<16x1xf32>
    %314 = vector.broadcast %313 : vector<16x1xf32> to vector<16x128xf32>
    %315 = arith.subf %307, %314 : vector<16x128xf32>
    %316 = arith.mulf %315, %315 : vector<16x128xf32>
    %cst_90 = arith.constant dense<0.000000e+00> : vector<16xf32>
    %317 = vector.multi_reduction <add>, %316, %cst_90 [1] : vector<16x128xf32> to vector<16xf32>
    %318 = vector.shape_cast %317 : vector<16xf32> to vector<16x1xf32>
    %cst_91 = arith.constant 1.280000e+02 : f32
    %319 = vector.broadcast %cst_91 : f32 to vector<16x1xf32>
    %320 = arith.divf %318, %319 : vector<16x1xf32>
    %321 = vector.broadcast %313 : vector<16x1xf32> to vector<16x128xf32>
    %322 = arith.subf %307, %321 : vector<16x128xf32>
    %cst_92 = arith.constant 9.99999996E-13 : f32
    %323 = vector.broadcast %cst_92 : f32 to vector<16x1xf32>
    %324 = arith.addf %320, %323 : vector<16x1xf32>
    %325 = math.rsqrt %324 : vector<16x1xf32>
    %326 = vector.broadcast %325 : vector<16x1xf32> to vector<16x128xf32>
    %327 = arith.mulf %322, %326 : vector<16x128xf32>
    %328 = vector.broadcast %308 : vector<1x128xf32> to vector<16x128xf32>
    %329 = arith.mulf %327, %328 : vector<16x128xf32>
    %330 = vector.broadcast %309 : vector<1x128xf32> to vector<16x128xf32>
    %331 = arith.addf %329, %330 : vector<16x128xf32>
    %c0_93 = arith.constant 0 : index
    %c0_94 = arith.constant 0 : index
    %332 = vector.load %arg16[%c0_93, %c0_94] : memref<16x128xf32, #tpu.memory_space<vmem>>, vector<16x128xf32>
    tpu.vector_store %arg16[%c0_93, %c0_94], %331 {strides = array<i32>} : memref<16x128xf32, #tpu.memory_space<vmem>>, vector<16x128xf32>,
    %c0_95 = arith.constant 0 : index
    %333 = memref.load %arg0[%c0_95] : memref<2xi32, #tpu.memory_space<smem>>
    %334 = arith.index_cast %333 : i32 to index
    %c0_96 = arith.constant 0 : index
    %335 = vector.load %arg16[%334, %c0_96] : memref<16x128xf32, #tpu.memory_space<vmem>>, vector<1x128xf32>
    %c1_97 = arith.constant 1 : index
    %336 = memref.load %arg0[%c1_97] : memref<2xi32, #tpu.memory_space<smem>>
    %337 = arith.index_cast %336 : i32 to index
    %c0_98 = arith.constant 0 : index
    %338 = vector.load %arg16[%337, %c0_98] : memref<16x128xf32, #tpu.memory_space<vmem>>, vector<1x128xf32>
    %339 = tpu.concatenate %335, %338 in 0 : vector<1x128xf32>, vector<1x128xf32> -> vector<2x128xf32>
    %340 = arith.truncf %339 : vector<2x128xf32> to vector<2x128xbf16>
    %c0_99 = arith.constant 0 : index
    %c0_100 = arith.constant 0 : index
    %341 = vector.load %arg11[%c0_99, %c0_100] : memref<128x128xbf16, #tpu.memory_space<vmem>>, vector<128x128xbf16>
    %cst_101 = arith.constant dense<0.000000e+00> : vector<2x128xf32>
    %342 = tpu.matmul %340, %341, %cst_101 {dimension_numbers = #tpu.dot_dimension_numbers<[1], [0], [0], [1], [0, 0, 1, 1], [], []>} : vector<2x128xbf16>, vector<128x128xbf16>, vector<2x128xf32> -> vector<2x128xf32>
    %343 = vector.extract_strided_slice %0 {offsets = [2, 0], sizes = [1, 128], strides = [1, 1]} : vector<10x128xf32> to vector<1x128xf32>
    %344 = vector.broadcast %343 : vector<1x128xf32> to vector<2x128xf32>
    %345 = arith.addf %342, %344 : vector<2x128xf32>
    %cst_102 = arith.constant 5.000000e-01 : f32
    %346 = vector.broadcast %cst_102 : f32 to vector<2x128xf32>
    %347 = arith.mulf %346, %345 : vector<2x128xf32>
    %cst_103 = arith.constant 4.471500e-02 : f32
    %348 = vector.broadcast %cst_103 : f32 to vector<2x128xf32>
    %349 = arith.mulf %348, %345 : vector<2x128xf32>
    %350 = arith.mulf %349, %345 : vector<2x128xf32>
    %351 = arith.mulf %350, %345 : vector<2x128xf32>
    %352 = arith.addf %345, %351 : vector<2x128xf32>
    %cst_104 = arith.constant 0.797884583 : f32
    %353 = vector.broadcast %cst_104 : f32 to vector<2x128xf32>
    %354 = arith.mulf %353, %352 : vector<2x128xf32>
    %355 = math.tanh %354 : vector<2x128xf32>
    %cst_105 = arith.constant 1.000000e+00 : f32
    %356 = vector.broadcast %cst_105 : f32 to vector<2x128xf32>
    %357 = arith.addf %356, %355 : vector<2x128xf32>
    %358 = arith.mulf %347, %357 : vector<2x128xf32>
    %359 = vector.extract_strided_slice %0 {offsets = [3, 0], sizes = [1, 128], strides = [1, 1]} : vector<10x128xf32> to vector<1x128xf32>
    %360 = vector.extract_strided_slice %0 {offsets = [4, 0], sizes = [1, 128], strides = [1, 1]} : vector<10x128xf32> to vector<1x128xf32>
    %cst_106 = arith.constant dense<0.000000e+00> : vector<2xf32>
    %361 = vector.multi_reduction <add>, %358, %cst_106 [1] : vector<2x128xf32> to vector<2xf32>
    %362 = vector.shape_cast %361 : vector<2xf32> to vector<2x1xf32>
    %cst_107 = arith.constant 1.280000e+02 : f32
    %363 = vector.broadcast %cst_107 : f32 to vector<2x1xf32>
    %364 = arith.divf %362, %363 : vector<2x1xf32>
    %365 = vector.broadcast %364 : vector<2x1xf32> to vector<2x128xf32>
    %366 = arith.subf %358, %365 : vector<2x128xf32>
    %367 = arith.mulf %366, %366 : vector<2x128xf32>
    %cst_108 = arith.constant dense<0.000000e+00> : vector<2xf32>
    %368 = vector.multi_reduction <add>, %367, %cst_108 [1] : vector<2x128xf32> to vector<2xf32>
    %369 = vector.shape_cast %368 : vector<2xf32> to vector<2x1xf32>
    %cst_109 = arith.constant 1.280000e+02 : f32
    %370 = vector.broadcast %cst_109 : f32 to vector<2x1xf32>
    %371 = arith.divf %369, %370 : vector<2x1xf32>
    %372 = vector.broadcast %364 : vector<2x1xf32> to vector<2x128xf32>
    %373 = arith.subf %358, %372 : vector<2x128xf32>
    %cst_110 = arith.constant 9.99999996E-13 : f32
    %374 = vector.broadcast %cst_110 : f32 to vector<2x1xf32>
    %375 = arith.addf %371, %374 : vector<2x1xf32>
    %376 = math.rsqrt %375 : vector<2x1xf32>
    %377 = vector.broadcast %376 : vector<2x1xf32> to vector<2x128xf32>
    %378 = arith.mulf %373, %377 : vector<2x128xf32>
    %379 = vector.broadcast %359 : vector<1x128xf32> to vector<2x128xf32>
    %380 = arith.mulf %378, %379 : vector<2x128xf32>
    %381 = vector.broadcast %360 : vector<1x128xf32> to vector<2x128xf32>
    %382 = arith.addf %380, %381 : vector<2x128xf32>
    %383 = arith.truncf %382 : vector<2x128xf32> to vector<2x128xbf16>
    %c0_111 = arith.constant 0 : index
    %c0_112 = arith.constant 0 : index
    %384 = vector.load %arg12[%c0_111, %c0_112] : memref<128x128xbf16, #tpu.memory_space<vmem>>, vector<128x128xbf16>
    %cst_113 = arith.constant dense<0.000000e+00> : vector<2x128xf32>
    %385 = tpu.matmul %383, %384, %cst_113 {dimension_numbers = #tpu.dot_dimension_numbers<[1], [0], [0], [1], [0, 0, 1, 1], [], []>} : vector<2x128xbf16>, vector<128x128xbf16>, vector<2x128xf32> -> vector<2x128xf32>
    %386 = vector.extract_strided_slice %0 {offsets = [5, 0], sizes = [1, 128], strides = [1, 1]} : vector<10x128xf32> to vector<1x128xf32>
    %387 = vector.broadcast %386 : vector<1x128xf32> to vector<2x128xf32>
    %388 = arith.addf %385, %387 : vector<2x128xf32>
    %389 = tpu.iota {dimensions = array<i32: 1>} : vector<1x128xi32>
    %c0_114 = arith.constant 0 : index
    %390 = memref.load %arg1[%c0_114] : memref<12xi32, #tpu.memory_space<smem>>
    %391 = vector.broadcast %390 : i32 to vector<1x128xi32>
    %392 = arith.cmpi eq, %389, %391 : vector<1x128xi32>
    %c1_115 = arith.constant 1 : index
    %393 = memref.load %arg1[%c1_115] : memref<12xi32, #tpu.memory_space<smem>>
    %394 = vector.broadcast %393 : i32 to vector<1x128xi32>
    %395 = arith.cmpi eq, %389, %394 : vector<1x128xi32>
    %396 = arith.ori %392, %395 : vector<1x128xi1>
    %c2 = arith.constant 2 : index
    %397 = memref.load %arg1[%c2] : memref<12xi32, #tpu.memory_space<smem>>
    %398 = vector.broadcast %397 : i32 to vector<1x128xi32>
    %399 = arith.cmpi eq, %389, %398 : vector<1x128xi32>
    %400 = arith.ori %396, %399 : vector<1x128xi1>
    %cst_116 = arith.constant 0.000000e+00 : f32
    %cst_117 = arith.constant -1.000000e+30 : f32
    %401 = vector.broadcast %cst_116 : f32 to vector<1x128xf32>
    %402 = vector.broadcast %cst_117 : f32 to vector<1x128xf32>
    %403 = arith.select %400, %401, %402 : vector<1x128xi1>, vector<1x128xf32>
    %404 = vector.broadcast %403 : vector<1x128xf32> to vector<2x128xf32>
    %405 = arith.addf %388, %404 : vector<2x128xf32>
    %cst_118 = arith.constant dense<0xFF800000> : vector<2xf32>
    %406 = vector.multi_reduction <maximumf>, %405, %cst_118 [1] : vector<2x128xf32> to vector<2xf32>
    %407 = vector.shape_cast %406 : vector<2xf32> to vector<2x1xf32>
    %c3 = arith.constant 3 : index
    %408 = memref.load %arg1[%c3] : memref<12xi32, #tpu.memory_space<smem>>
    %409 = vector.broadcast %408 : i32 to vector<1x128xi32>
    %410 = arith.cmpi eq, %389, %409 : vector<1x128xi32>
    %c4 = arith.constant 4 : index
    %411 = memref.load %arg1[%c4] : memref<12xi32, #tpu.memory_space<smem>>
    %412 = vector.broadcast %411 : i32 to vector<1x128xi32>
    %413 = arith.cmpi eq, %389, %412 : vector<1x128xi32>
    %414 = arith.ori %410, %413 : vector<1x128xi1>
    %c5 = arith.constant 5 : index
    %415 = memref.load %arg1[%c5] : memref<12xi32, #tpu.memory_space<smem>>
    %416 = vector.broadcast %415 : i32 to vector<1x128xi32>
    %417 = arith.cmpi eq, %389, %416 : vector<1x128xi32>
    %418 = arith.ori %414, %417 : vector<1x128xi1>
    %cst_119 = arith.constant 0.000000e+00 : f32
    %cst_120 = arith.constant -1.000000e+30 : f32
    %419 = vector.broadcast %cst_119 : f32 to vector<1x128xf32>
    %420 = vector.broadcast %cst_120 : f32 to vector<1x128xf32>
    %421 = arith.select %418, %419, %420 : vector<1x128xi1>, vector<1x128xf32>
    %422 = vector.broadcast %421 : vector<1x128xf32> to vector<2x128xf32>
    %423 = arith.addf %388, %422 : vector<2x128xf32>
    %cst_121 = arith.constant dense<0xFF800000> : vector<2xf32>
    %424 = vector.multi_reduction <maximumf>, %423, %cst_121 [1] : vector<2x128xf32> to vector<2xf32>
    %425 = vector.shape_cast %424 : vector<2xf32> to vector<2x1xf32>
    %c6 = arith.constant 6 : index
    %426 = memref.load %arg1[%c6] : memref<12xi32, #tpu.memory_space<smem>>
    %427 = vector.broadcast %426 : i32 to vector<1x128xi32>
    %428 = arith.cmpi eq, %389, %427 : vector<1x128xi32>
    %c7 = arith.constant 7 : index
    %429 = memref.load %arg1[%c7] : memref<12xi32, #tpu.memory_space<smem>>
    %430 = vector.broadcast %429 : i32 to vector<1x128xi32>
    %431 = arith.cmpi eq, %389, %430 : vector<1x128xi32>
    %432 = arith.ori %428, %431 : vector<1x128xi1>
    %c8 = arith.constant 8 : index
    %433 = memref.load %arg1[%c8] : memref<12xi32, #tpu.memory_space<smem>>
    %434 = vector.broadcast %433 : i32 to vector<1x128xi32>
    %435 = arith.cmpi eq, %389, %434 : vector<1x128xi32>
    %436 = arith.ori %432, %435 : vector<1x128xi1>
    %cst_122 = arith.constant 0.000000e+00 : f32
    %cst_123 = arith.constant -1.000000e+30 : f32
    %437 = vector.broadcast %cst_122 : f32 to vector<1x128xf32>
    %438 = vector.broadcast %cst_123 : f32 to vector<1x128xf32>
    %439 = arith.select %436, %437, %438 : vector<1x128xi1>, vector<1x128xf32>
    %440 = vector.broadcast %439 : vector<1x128xf32> to vector<2x128xf32>
    %441 = arith.addf %388, %440 : vector<2x128xf32>
    %cst_124 = arith.constant dense<0xFF800000> : vector<2xf32>
    %442 = vector.multi_reduction <maximumf>, %441, %cst_124 [1] : vector<2x128xf32> to vector<2xf32>
    %443 = vector.shape_cast %442 : vector<2xf32> to vector<2x1xf32>
    %c9 = arith.constant 9 : index
    %444 = memref.load %arg1[%c9] : memref<12xi32, #tpu.memory_space<smem>>
    %445 = vector.broadcast %444 : i32 to vector<1x128xi32>
    %446 = arith.cmpi eq, %389, %445 : vector<1x128xi32>
    %c10 = arith.constant 10 : index
    %447 = memref.load %arg1[%c10] : memref<12xi32, #tpu.memory_space<smem>>
    %448 = vector.broadcast %447 : i32 to vector<1x128xi32>
    %449 = arith.cmpi eq, %389, %448 : vector<1x128xi32>
    %450 = arith.ori %446, %449 : vector<1x128xi1>
    %c11 = arith.constant 11 : index
    %451 = memref.load %arg1[%c11] : memref<12xi32, #tpu.memory_space<smem>>
    %452 = vector.broadcast %451 : i32 to vector<1x128xi32>
    %453 = arith.cmpi eq, %389, %452 : vector<1x128xi32>
    %454 = arith.ori %450, %453 : vector<1x128xi1>
    %cst_125 = arith.constant 0.000000e+00 : f32
    %cst_126 = arith.constant -1.000000e+30 : f32
    %455 = vector.broadcast %cst_125 : f32 to vector<1x128xf32>
    %456 = vector.broadcast %cst_126 : f32 to vector<1x128xf32>
    %457 = arith.select %454, %455, %456 : vector<1x128xi1>, vector<1x128xf32>
    %458 = vector.broadcast %457 : vector<1x128xf32> to vector<2x128xf32>
    %459 = arith.addf %388, %458 : vector<2x128xf32>
    %cst_127 = arith.constant dense<0xFF800000> : vector<2xf32>
    %460 = vector.multi_reduction <maximumf>, %459, %cst_127 [1] : vector<2x128xf32> to vector<2xf32>
    %461 = vector.shape_cast %460 : vector<2xf32> to vector<2x1xf32>
    %462 = tpu.concatenate %407, %425, %443, %461 in 1 : vector<2x1xf32>, vector<2x1xf32>, vector<2x1xf32>, vector<2x1xf32> -> vector<2x4xf32>
    %c0_128 = arith.constant 0 : index
    %c0_129 = arith.constant 0 : index
    %463 = vector.load %arg15[%c0_128, %c0_129] : memref<2x4xf32, #tpu.memory_space<vmem>>, vector<2x4xf32>
    tpu.vector_store %arg15[%c0_128, %c0_129], %462 {strides = array<i32>} : memref<2x4xf32, #tpu.memory_space<vmem>>, vector<2x4xf32>,
    return
  }
}

</mosaic_0001>

<bundles_post_ra>
// kernel: cloze_forward.1
= control target key start
LH: loop header
LB: loop body
LE: loop exit
PB: predicated region body
PF: predicated region fallthrough
CT: control target
= control target key end

     0   :  { %20 = vsyncpa [#allocation5], 0  ;;  %s4468_s0 = inlined_call_operand.vmem [shape: s32[2], index: 0, kind: input, shape index: {}]   ;;  %s4469_s1 = inlined_call_operand.vmem [shape: s32[12], index: 1, kind: input, shape index: {}]   ;;  %s4470_s2 = inlined_call_operand.vmem [shape: s32[16,1], index: 2, kind: input, shape index: {}]   ;;  %s4471_s3 = inlined_call_operand.vmem [shape: bf16[128,128], index: 3, kind: input, shape index: {}]   ;;  %s4472_s4 = inlined_call_operand.vmem [shape: f32[16,128], index: 4, kind: input, shape index: {}]   ;;  %s4473_s5 = inlined_call_operand.vmem [shape: f32[16,64], index: 5, kind: input, shape index: {}]   ;;  %s4474_s6 = inlined_call_operand.vmem [shape: f32[64,64], index: 6, kind: input, shape index: {}]   ;;  %s4475_s7 = inlined_call_operand.vmem [shape: bf16[2,128,384], index: 7, kind: input, shape index: {}]   ;;  %s4476_s8 = inlined_call_operand.vmem [shape: bf16[2,128,128], index: 8, kind: input, shape index: {}]   ;;  %s4477_s9 = inlined_call_operand.vmem [shape: bf16[2,128,128], index: 9, kind: input, shape index: {}]   ;;  %s4478_s10 = inlined_call_operand.vmem [shape: bf16[2,128,128], index: 10, kind: input, shape index: {}]   ;;  %s4479_s11 = inlined_call_operand.vmem [shape: bf16[128,128], index: 11, kind: input, shape index: {}]   ;;  %s4480_s12 = inlined_call_operand.vmem [shape: bf16[128,128], index: 12, kind: input, shape index: {}]   ;;  %s4481_s13 = inlined_call_operand.vmem [shape: f32[2,10,128], index: 13, kind: input, shape index: {}]   ;;  %s4482_s14 = inlined_call_operand.vmem [shape: f32[10,128], index: 14, kind: input, shape index: {}]   ;;  %s4483_s15 = inlined_call_operand.hbm [shape: f32[2,4], index: 15, kind: output, shape index: {}]  }
   0x1   :  { %21 = vsyncpa [#allocation7], 0 }
   0x2   :  { %22 = vsyncpa [#allocation4], 0  ;;  %s29_s20 = sshll.u32 %s4468_s0, 4  ;;  %s39_s23 = sshll.u32 %s4469_s1, 4  ;;  %s30_s20 = int_to_ptr.vmem [resolvable:$true] %s29_s20  ;;  %s40_s23 = int_to_ptr.vmem [resolvable:$true] %s39_s23 }
   0x3   :  { %s3369_s24 = scalar_lea.vmem %s30_s20, 16  ;;  %p3374_p1 = scmp.lt.s32.totalorder %s30_s20, %s30_s20 }
   0x4   :  { %p3370_p0 = scmp.ne.s32.totalorder %s30_s20, %s3369_s24  ;;  %p3375_p2 = scmp.lt.s32.totalorder %s3369_s24, %s3369_s24 }
   0x6   :  { %p3376_p3 = por %p3375_p2, %p3374_p1 }
   0x8   :  { %p3377_p4 = pnand %p3376_p3, %p3370_p0 }
   0xa   :  { %3380 = shalt.err (!%p3377_p4)
}
   0xb   :  { %s3419_s25 = smov [#allocation3]   ;;  %s3381_s26 = scalar_lea.vmem %s40_s23, 16 }
   0xc   :  { %32 = dma.vmem_to_smem %s30_s20, 16, %s3419_s25, [#allocation5]  }
   0xd   :  { %p3382_p5 = scmp.ne.s32.totalorder %s40_s23, %s3381_s26  ;;  %p3386_p6 = scmp.lt.s32.totalorder %s40_s23, %s40_s23 }
   0xe   :  { %p3387_p7 = scmp.lt.s32.totalorder %s3381_s26, %s3381_s26 }
  0x10   :  { %p3388_p8 = por %p3387_p7, %p3386_p6 }
  0x12   :  { %p3389_p9 = pnand %p3388_p8, %p3382_p5 }
  0x14   :  { %3392 = shalt.err (!%p3389_p9)
}
  0x15   :  { %s3420_s0 = smov [#allocation6]  }
  0x16   :  { %42 = dma.vmem_to_smem %s40_s23, 16, %s3420_s0, [#allocation7]  }
  0x17   :  { %3413 = dma.done.wait [#allocation5], 16  }
  0x18   :  { %3414 = vsyncadd [#allocation5], 4294967280 }
  0x19   :  { %3415 = dma.done.wait [#allocation7], 16  }
  0x1a   :  { %3416 = vsyncadd [#allocation7], 4294967280 }
  0x1b   :  { %75 = sfence }
  0x1c   :  { %v81_v0 = vld [vmem:[%s4470_s2] sm:$0xff]  ;;  %v3421_v1 = vmov 0   ;;  %v3422_v2 = vmov 0.0   ;;  %v3184_v3 = vld [vmem:[%s4471_s3 + $0x38] sm:$0xff]   ;;  %v82_v4 = vld [vmem:[%s4470_s2 + $0x8] sm:$0xff]  ;;  %vm3423_vm0 = vmmov 0   ;;  %v79_v12 = vlaneseq }
  0x1d   :  { %3183 = vset.pattern.permute.xlu0 %v3421_v1  ;;  %2853 = vmatprep.subr.bf16.mxu0 %v3422_v2  ;;  %v3185_v5 = vld [vmem:[%s4471_s3 + $0x30] sm:$0xff]   ;;  %v3186_v6 = vld [vmem:[%s4471_s3 + $0x28] sm:$0xff]   ;;  %v3187_v7 = vld [vmem:[%s4471_s3 + $0x20] sm:$0xff]   ;;  %v3424_v16 = vmov 1.0|1.0   ;;  %vm627_vm4 = vcmask 523264  }
  0x1e   :  { %84 = vperm.xlu0 %3183, %v81_v0   ;;  %441 = vmatprep.mubr.bf16.mxu1 %v3421_v1  ;;  %v3188_v8 = vld [vmem:[%s4471_s3 + $0x18] sm:$0xff]   ;;  %v3189_v9 = vld [vmem:[%s4471_s3 + $0x10] sm:$0xff]   ;;  %v3190_v10 = vld [vmem:[%s4471_s3 + $0x8] sm:$0xff]   ;;  %v3557_v14 = vand.u32 127, %v79_v12  ;;  %v3659_v63 = vshrl.u32 %v79_v12, 7  ;;  %vm2141_vm5 = vcmask 1040384  }
  0x1f   :  { %2854 = vmatpush3.bf16.msra.mxu0 %v3184_v3  ;;  %2869 = vmatprep.mubr.msk.bf16.mxu0 %vm3423_vm0, %v3422_v2  ;;  %v3191_v11 = vld [vmem:[%s4471_s3] sm:$0xff]   ;;  %v111_v21 = vld [vmem:[%s4472_s4 + $0x8] sm:$0xff]  ;;  %v3195_v27 = vld [vmem:[%s4475_s7 + $0xb0] ss:$12 sps:$4 sm:$0xff]   ;;  %s2132_s3 = sld [smem:[#allocation3]]  ;;  %vm2261_vm6 = vcmask 1041408  }
  0x20   :  { %2855 = vmatprep.subr.bf16.mxu0 %v3422_v2  ;;  %v110_v17 = vld [vmem:[%s4472_s4] sm:$0xff]  ;;  %v3192_v25 = vld [vmem:[%s4475_s7 + $0xac] ss:$12 sps:$4 sm:$0xff]   ;;  %v3194_v26 = vld [vmem:[%s4475_s7 + $0xa8] ss:$12 sps:$4 sm:$0xff]   ;;  %v3662_v0 = vsub.s32 0, %v3659_v63 }
  0x21   :  { %409 = vmatprep.subr.bf16.mxu1 %v3192_v25  ;;  %v3196_v36 = vld [vmem:[%s4475_s7 + $0x94] ss:$12 sps:$4 sm:$0xff]   ;;  %v3198_v37 = vld [vmem:[%s4475_s7 + $0x90] ss:$12 sps:$4 sm:$0xff]   ;;  %v3199_v38 = vld [vmem:[%s4475_s7 + $0x98] ss:$12 sps:$4 sm:$0xff]  }
  0x22   :  { %87 = vperm.xlu0 %3183, %v82_v4   ;;  %410 = vmatpush1.bf16.msra.mxu1 %v3194_v26  ;;  %v3200_v39 = vld [vmem:[%s4475_s7 + $0x7c] ss:$12 sps:$4 sm:$0xff]   ;;  %v3202_v40 = vld [vmem:[%s4475_s7 + $0x78] ss:$12 sps:$4 sm:$0xff]   ;;  %v3203_v41 = vld [vmem:[%s4475_s7 + $0x80] ss:$12 sps:$4 sm:$0xff]  }
  0x23   :  { %2856 = vmatpush3.bf16.msra.mxu0 %v3185_v5  ;;  %411 = vmatprep.subr.bf16.mxu1 %v3196_v36  ;;  %v3204_v42 = vld [vmem:[%s4475_s7 + $0x64] ss:$12 sps:$4 sm:$0xff]   ;;  %v3206_v43 = vld [vmem:[%s4475_s7 + $0x60] ss:$12 sps:$4 sm:$0xff]   ;;  %v3207_v44 = vld [vmem:[%s4475_s7 + $0x68] ss:$12 sps:$4 sm:$0xff]  }
  0x24   :  { %2857 = vmatprep.subr.bf16.mxu0 %v3422_v2  ;;  %v3208_v45 = vld [vmem:[%s4475_s7 + $0x4c] ss:$12 sps:$4 sm:$0xff]   ;;  %v3210_v46 = vld [vmem:[%s4475_s7 + $0x48] ss:$12 sps:$4 sm:$0xff]   ;;  %v3211_v47 = vld [vmem:[%s4475_s7 + $0x50] ss:$12 sps:$4 sm:$0xff]  }
  0x25   :  { %v3212_v48 = vld [vmem:[%s4475_s7 + $0x34] ss:$12 sps:$4 sm:$0xff]   ;;  %v3214_v49 = vld [vmem:[%s4475_s7 + $0x30] ss:$12 sps:$4 sm:$0xff]   ;;  %v3215_v50 = vld [vmem:[%s4475_s7 + $0x38] ss:$12 sps:$4 sm:$0xff]  }
  0x26   :  { %412 = vmatpush1.bf16.msra.mxu1 %v3198_v37  ;;  %v3216_v51 = vld [vmem:[%s4475_s7 + $0x1c] ss:$12 sps:$4 sm:$0xff]   ;;  %v3218_v52 = vld [vmem:[%s4475_s7 + $0x18] ss:$12 sps:$4 sm:$0xff]   ;;  %v3219_v53 = vld [vmem:[%s4475_s7 + $0x20] ss:$12 sps:$4 sm:$0xff]  }
  0x27   :  { %2858 = vmatpush3.bf16.msra.mxu0 %v3186_v6  ;;  %413 = vmatprep.subr.bf16.mxu1 %v3200_v39  ;;  %v3220_v54 = vld [vmem:[%s4475_s7 + $0x4] ss:$12 sps:$4 sm:$0xff]   ;;  %v3222_v55 = vld [vmem:[%s4475_s7] ss:$12 sps:$4 sm:$0xff]   ;;  %v3223_v56 = vld [vmem:[%s4475_s7 + $0x8] ss:$12 sps:$4 sm:$0xff]  }
  0x28   :  { %2859 = vmatprep.subr.bf16.mxu0 %v3422_v2  ;;  %v77_v3 = vld [vmem:[%s4482_s14] sm:$0xff]  ;;  %s2695_s24 = sld [smem:[#allocation6 + $0x1]]  ;;  %s3426_s28 = smov [#allocation8]  }
  0x29   :  { %v227_v6 = vrot.slane %v77_v3, %v3662_v0  ;;  %s2697_s25 = sld [smem:[#allocation6 + $0x3]]  ;;  %s2472_s29 = sshll.u32 %s3426_s28, 4  ;;  %s2473_s29 = int_to_ptr.vmem [resolvable:$true] %s2472_s29 }
  0x2a   :  { %414 = vmatpush1.bf16.msra.mxu1 %v3202_v40  ;;  %s2698_s26 = sld [smem:[#allocation6 + $0x4]]  ;;  %p3398_p11 = scmp.lt.s32.totalorder %s2473_s29, %s2473_s29 }
  0x2b   :  { %2860 = vmatpush3.bf16.msra.mxu0 %v3187_v7  ;;  %415 = vmatprep.subr.bf16.mxu1 %v3204_v42  ;;  %v3670_v7 = vsub.s32 1, %v3659_v63  ;;  %s2699_s0 = sld [smem:[#allocation6 + $0x5]] }
  0x2c   :  { %2861 = vmatprep.subr.bf16.mxu0 %v3422_v2  ;;  %s2700_s1 = sld [smem:[#allocation6 + $0x6]] }
  0x2d   :  { %s2701_s27 = sld [smem:[#allocation6 + $0x7]] }
  0x2e   :  { %416 = vmatpush1.bf16.msra.mxu1 %v3206_v43 }
  0x2f   :  { %2862 = vmatpush3.bf16.msra.mxu0 %v3188_v8  ;;  %417 = vmatprep.subr.bf16.mxu1 %v3208_v45 }
  0x30   :  { %2863 = vmatprep.subr.bf16.mxu0 %v3422_v2 }
  0x32   :  { %418 = vmatpush1.bf16.msra.mxu1 %v3210_v46 }
  0x33   :  { %2864 = vmatpush3.bf16.msra.mxu0 %v3189_v9  ;;  %419 = vmatprep.subr.bf16.mxu1 %v3212_v48 }
  0x34   :  { %2865 = vmatprep.subr.bf16.mxu0 %v3422_v2 }
  0x36   :  { %420 = vmatpush1.bf16.msra.mxu1 %v3214_v49 }
  0x37   :  { %2866 = vmatpush3.bf16.msra.mxu0 %v3190_v10  ;;  %421 = vmatprep.subr.bf16.mxu1 %v3216_v51 }
  0x38   :  { %2867 = vmatprep.subr.bf16.mxu0 %v3422_v2 }
  0x3a   :  { %422 = vmatpush1.bf16.msra.mxu1 %v3218_v52 }
  0x3b   :  { %2868 = vmatpush3.bf16.msra.mxu0 %v3191_v11  ;;  %423 = vmatprep.subr.bf16.mxu1 %v3220_v54  ;;  %v233_v11 = vrot.slane %v77_v3, %v3670_v7 }
  0x3c   :  { %2873 = vmatprep.subr.bf16.mxu0 %v3422_v2 }
  0x3e   :  { %424 = vmatpush1.bf16.msra.mxu1 %v3222_v55 }
  0x3f   :  { %2893 = vmatprep.subr.bf16.mxu1 %v3422_v2 }
  0x99   :  { %v85_v13 = vpop.permute.xlu0 %84 }
  0x9a   :  { %vm89_vm1 = vcmp.eq.s32.totalorder %v3557_v14, %v85_v13 }
  0x9d   :  { %v88_v15 = vpop.permute.xlu0 %87 }
  0x9e   :  { %vm90_vm2 = vcmp.eq.s32.totalorder %v3557_v14, %v88_v15 }
  0x9f   :  { %vm2492_vm3 = vmpackc.low %vm90_vm2, %vm89_vm1 }
  0xa0   :  { %2870 = vmatmul.mubr.msk.bf16.vlgmr.msra.gmra.mxu0 %vm2492_vm3, %v3424_v16 }
  0xa1   :  { %2889 = vmatprep.mubr.msk.bf16.mxu0 %vm3423_vm0, %v3422_v2  ;;  %2874 = vmatpush3.bf16.msra.mxu0 %v3195_v27 }
  0xa2   :  { %2875 = vmatprep.subr.bf16.mxu0 %v3422_v2 }
  0xa5   :  { %2876 = vmatpush3.bf16.msra.mxu0 %v3199_v38 }
  0xa6   :  { %2877 = vmatprep.subr.bf16.mxu0 %v3422_v2 }
  0xa9   :  { %2878 = vmatpush3.bf16.msra.mxu0 %v3203_v41 }
  0xaa   :  { %2879 = vmatprep.subr.bf16.mxu0 %v3422_v2 }
  0xad   :  { %2880 = vmatpush3.bf16.msra.mxu0 %v3207_v44 }
  0xae   :  { %2881 = vmatprep.subr.bf16.mxu0 %v3422_v2 }
  0xb1   :  { %2882 = vmatpush3.bf16.msra.mxu0 %v3211_v47 }
  0xb2   :  { %2883 = vmatprep.subr.bf16.mxu0 %v3422_v2 }
  0xb5   :  { %2884 = vmatpush3.bf16.msra.mxu0 %v3215_v50 }
  0xb6   :  { %2885 = vmatprep.subr.bf16.mxu0 %v3422_v2 }
  0xb9   :  { %2886 = vmatpush3.bf16.msra.mxu0 %v3219_v53 }
  0xba   :  { %2887 = vmatprep.subr.bf16.mxu0 %v3422_v2 }
  0xbd   :  { %2888 = vmatpush3.bf16.msra.mxu0 %v3223_v56 }
  0xbe   :  { %2944 = vmatprep.subr.bf16.mxu0 %v3422_v2 }
 0x160   :  { %v194_v18 = vpop.f32.mrf.mxu0 }
 0x161   :  { %v195_v19 = vadd.f32 %v194_v18, %v110_v17  ;;  %v3687_v17 = vld [vmem:[%s4481_s13] sm:$0xff]  ;;  %v3690_v18 = vsub.s32 2, %v3659_v63 }
 0x162   :  { %v2871_v20 = vpop.f32.mrf.mxu0  ;;  %v504_v26 = vrot.slane %v3687_v17, %v3670_v7 }
 0x163   :  { %201 = vadd.xlane.f32.xlu1 %v195_v19  ;;  %v3695_v20 = vsub.s32 6, %v3659_v63 }
 0x164   :  { %v197_v22 = vpop.f32.mrf.mxu0 }
 0x165   :  { %v198_v23 = vadd.f32 %v197_v22, %v111_v21  ;;  %v3698_v21 = vsub.s32 7, %v3659_v63  ;;  %v510_v22 = vrot.slane %v3687_v17, %v3690_v18 }
 0x166   :  { %v2872_v24 = vpop.f32.mrf.mxu0 }
 0x167   :  { %203 = vadd.xlane.f32.xlu1 %v198_v23 }
 0x1ec   :  { %v202_v28 = vpop.xlane.xlu1 %201 }
 0x1ed   :  { %v206_v29 = vmul.f32 0.0078125, %v202_v28  ;;  %v3708_v28 = vrot.slane %v77_v3, %v3695_v20 }
 0x1ef   :  { %v3579_v30 = vsub.f32 %v195_v19, %v206_v29  ;;  %v496_v19 = vrot.slane %v3687_v17, %v3662_v0  ;;  %v3711_v29 = vrot.slane %v77_v3, %v3698_v21 }
 0x1f0   :  { %v204_v31 = vpop.xlane.xlu1 %203 }
 0x1f1   :  { %v207_v32 = vmul.f32 0.0078125, %v204_v31  ;;  %v210_v33 = vmul.f32 %v3579_v30, %v3579_v30 }
 0x1f3   :  { %v3583_v34 = vsub.f32 %v198_v23, %v207_v32  ;;  %212 = vadd.xlane.f32.xlu0 %v210_v33  ;;  %v78_v23 = vld [vmem:[%s4482_s14 + $0x8] sm:$0x3] }
 0x1f4   :  { %v3714_v31 = vrot.slane %v78_v23, %v3662_v0 }
 0x1f5   :  { %v211_v35 = vmul.f32 %v3583_v34, %v3583_v34 }
 0x1f7   :  { %214 = vadd.xlane.f32.xlu1 %v211_v35 }
 0x27c   :  { %v213_v57 = vpop.xlane.xlu0 %212 }
 0x27d   :  { %v216_v58 = vmul.f32 0.0078125, %v213_v57 }
 0x27f   :  { %v218_v59 = vadd.f32 1e-12, %v216_v58 }
 0x280   :  { %v215_v60 = vpop.xlane.xlu1 %214 }
 0x281   :  { %3320 = vrsqrt.f32 %v218_v59  ;;  %v217_v61 = vmul.f32 0.0078125, %v215_v60 }
 0x283   :  { %v219_v62 = vadd.f32 1e-12, %v217_v61 }
 0x285   :  { %3322 = vrsqrt.f32 %v219_v62 }
 0x28e   :  { %v3321_v4 = vpop.eup %3320 }
 0x28f   :  { %v222_v5 = vmul.f32 %v3321_v4, %v3579_v30 }
 0x291   :  { %v228_v10 = vmul.f32 %v227_v6, %v222_v5 }
 0x292   :  { %v3323_v8 = vpop.eup %3322 }
 0x293   :  { %v223_v9 = vmul.f32 %v3323_v8, %v3583_v34  ;;  %v3674_v13 = vadd.f32 %v233_v11, %v228_v10  ;;  %v3717_v34 = vrot.slane %v78_v23, %v3670_v7 }
 0x295   :  { %v229_v12 = vmul.f32 %v227_v6, %v223_v9 }
 0x297   :  { %v3676_v15 = vadd.f32 %v233_v11, %v229_v12 }
 0x299   :  { %v248_v16 = vpack.c.bf16 %v3676_v15, %v3674_v13 }
 0x29b   :  { %442 = vmatmul.mubr.bf16.vlgmr.msra.gmra.mxu1 %v248_v16  ;;  %2890 = vmatmul.mubr.bf16.vlgmr.msra.gmra.mxu0 %v248_v16 }
 0x29c   :  { %2909 = vmatprep.mubr.msk.bf16.mxu1 %vm3423_vm0, %v3422_v2  ;;  %2960 = vmatprep.mubr.msk.bf16.mxu0 %vm3423_vm0, %v3422_v2 }
 0x35b   :  { %v443_v24 = vpop.f32.mrf.mxu1  ;;  %v486_v25 = vpop.f32.mrf.mxu0 }
 0x35c   :  { %v497_v27 = vadd.f32 %v496_v19, %v443_v24  ;;  %v511_v30 = vadd.f32 %v510_v22, %v486_v25 }
 0x35d   :  { %v445_v32 = vpop.f32.mrf.mxu1  ;;  %v2891_v33 = vpop.f32.mrf.mxu0 }
 0x35e   :  { %v505_v35 = vadd.f32 %v504_v26, %v445_v32  ;;  %v3719_v38 = vmul.f32 0.17677669, %v497_v27  ;;  %v3722_v41 = vmul.f32 %v3708_v28, %v511_v30  ;;  %v3725_v42 = vmul.f32 %v3711_v29, %v511_v30 }
 0x35f   :  { %v447_v36 = vpop.f32.mrf.mxu1  ;;  %v489_v37 = vpop.f32.mrf.mxu0  ;;  %v3728_v43 = vmul.f32 %v3714_v31, %v511_v30  ;;  %v3743_v51 = vmul.f32 %v3717_v34, %v511_v30 }
 0x360   :  { %v498_v39 = vadd.f32 %v496_v19, %v447_v36  ;;  %v512_v40 = vadd.f32 %v510_v22, %v489_v37  ;;  %v517_v46 = vmul.f32 %v3708_v28, %v505_v35  ;;  %v523_v60 = vmul.f32 %v3711_v29, %v505_v35 }
 0x361   :  { %v449_v44 = vpop.f32.mrf.mxu1  ;;  %v2892_v45 = vpop.f32.mrf.mxu0  ;;  %v529_v62 = vmul.f32 %v3714_v31, %v505_v35  ;;  %v535_v4 = vmul.f32 %v3717_v34, %v505_v35 }
 0x362   :  { %v3731_v47 = vmul.f32 0.17677669, %v498_v39  ;;  %v3734_v48 = vmul.f32 %v3708_v28, %v512_v40  ;;  %v3737_v49 = vmul.f32 %v3711_v29, %v512_v40  ;;  %v3740_v50 = vmul.f32 %v3714_v31, %v512_v40  ;;  %546 = vxpose.xlu1.b32.start [1/8] (short) %v517_v46, 128  ;;  %v3775_v45 = vld [vmem:[%s4473_s5] sm:$0xff] }
 0x363   :  { %v3746_v52 = vmul.f32 %v3717_v34, %v512_v40  ;;  %v506_v53 = vadd.f32 %v504_v26, %v449_v44 }
 0x364   :  { %v545_v54 = vpack.c.bf16 %v3731_v47, %v3719_v38  ;;  %v728_v55 = vpack.c.bf16 %v3740_v50, %v3728_v43  ;;  %v727_v56 = vpack.c.bf16 %v3737_v49, %v3725_v42  ;;  %v726_v57 = vpack.c.bf16 %v3734_v48, %v3722_v41  ;;  %v3225_v43 = vld [vmem:[%s4476_s8 + $0x30] sm:$0xff]   ;;  %v3226_v42 = vld [vmem:[%s4476_s8 + $0x28] sm:$0xff]   ;;  %v3227_v41 = vld [vmem:[%s4476_s8 + $0x20] sm:$0xff]  }
 0x365   :  { %v518_v58 = vmul.f32 %v3708_v28, %v506_v53  ;;  %v729_v59 = vpack.c.bf16 %v3746_v52, %v3743_v51  ;;  %v524_v61 = vmul.f32 %v3711_v29, %v506_v53  ;;  %v530_v3 = vmul.f32 %v3714_v31, %v506_v53  ;;  %v3224_v51 = vld [vmem:[%s4476_s8 + $0x38] sm:$0xff]   ;;  %v3229_v49 = vld [vmem:[%s4476_s8 + $0x10] sm:$0xff]  }
 0x366   :  { %v536_v5 = vmul.f32 %v3717_v34, %v506_v53  ;;  %2945 = vmatpush3.bf16.msra.mxu0 %v3224_v51  ;;  %v3228_v48 = vld [vmem:[%s4476_s8 + $0x18] sm:$0xff]   ;;  %v3234_v51 = vld [vmem:[%s4477_s9 + $0x28] sm:$0xff]  }
 0x367   :  { %547 = vxpose.xlu1.b32.cont [2/8] (short) %v518_v58, 128  ;;  %v3781_v58 = vld [vmem:[%s4473_s5 + $0x8] sm:$0xff]  ;;  %2946 = vmatprep.subr.bf16.mxu0 %v3422_v2 }
 0x36a   :  { %2947 = vmatpush3.bf16.msra.mxu0 %v3225_v43  ;;  %v3235_v43 = vld [vmem:[%s4477_s9 + $0x20] sm:$0xff]  }
 0x36b   :  { %548 = vxpose.xlu1.b32.cont [3/8] (short) %v523_v60, 128  ;;  %2948 = vmatprep.subr.bf16.mxu0 %v3422_v2 }
 0x36e   :  { %2949 = vmatpush3.bf16.msra.mxu0 %v3226_v42  ;;  %v3236_v42 = vld [vmem:[%s4477_s9 + $0x18] sm:$0xff]  }
 0x36f   :  { %549 = vxpose.xlu1.b32.cont [4/8] (short) %v524_v61, 128  ;;  %2950 = vmatprep.subr.bf16.mxu0 %v3422_v2 }
 0x372   :  { %2951 = vmatpush3.bf16.msra.mxu0 %v3227_v41  ;;  %v3237_v41 = vld [vmem:[%s4477_s9 + $0x10] sm:$0xff]  }
 0x373   :  { %550 = vxpose.xlu1.b32.cont [5/8] (short) %v529_v62, 128  ;;  %2952 = vmatprep.subr.bf16.mxu0 %v3422_v2 }
 0x376   :  { %2953 = vmatpush3.bf16.msra.mxu0 %v3228_v48  ;;  %v3238_v48 = vld [vmem:[%s4477_s9 + $0x8] sm:$0xff]  }
 0x377   :  { %551 = vxpose.xlu1.b32.cont [6/8] (short) %v530_v3, 128  ;;  %2954 = vmatprep.subr.bf16.mxu0 %v3422_v2 }
 0x37a   :  { %2955 = vmatpush3.bf16.msra.mxu0 %v3229_v49  ;;  %v3239_v49 = vld [vmem:[%s4477_s9] sm:$0xff]  }
 0x37b   :  { %552 = vxpose.xlu1.b32.cont [7/8] (short) %v535_v4, 128  ;;  %v3789_v4 = vld [vmem:[%s4474_s6 + $0x38] sm:$0xff]  ;;  %2956 = vmatprep.subr.bf16.mxu0 %v3422_v2 }
 0x37f   :  { %553 = vxpose.xlu1.b32.end [8/8] (short) %v536_v5, 128  ;;  %v3796_v5 = vld [vmem:[%s4474_s6 + $0x30] sm:$0xff] }
 0x3df   :  { %v562_v6 = vpop.trf.xlu1 }
 0x3e3   :  { %v563_v8 = vpop.trf.xlu1 }
 0x3e4   :  { %v578_v9 = vpack.c.bf16 %v563_v8, %v562_v6  ;;  %v3803_v6 = vld [vmem:[%s4474_s6 + $0x28] sm:$0xff]  ;;  %v3808_v8 = vld [vmem:[%s4474_s6 + $0x20] sm:$0xff] }
 0x3e7   :  { %v564_v10 = vpop.trf.xlu1 }
 0x3eb   :  { %v565_v11 = vpop.trf.xlu1 }
 0x3ec   :  { %v579_v12 = vpack.c.bf16 %v565_v11, %v564_v10  ;;  %v3822_v10 = vld [vmem:[%s4474_s6 + $0x10] sm:$0xff]  ;;  %v3829_v11 = vld [vmem:[%s4474_s6 + $0x8] sm:$0xff] }
 0x3ef   :  { %v566_v16 = vpop.trf.xlu1 }
 0x3f3   :  { %v567_v19 = vpop.trf.xlu1 }
 0x3f4   :  { %v580_v44 = vpack.c.bf16 %v567_v19, %v566_v16 }
 0x3f7   :  { %v568_v22 = vpop.trf.xlu1 }
 0x3fb   :  { %v569_v23 = vpop.trf.xlu1 }
 0x3fc   :  { %v581_v40 = vpack.c.bf16 %v569_v23, %v568_v22 }
 0x3ff   :  { %v570_v24 = vpop.trf.xlu1 }
 0x403   :  { %v571_v25 = vpop.trf.xlu1 }
 0x404   :  { %v582_v39 = vpack.c.bf16 %v571_v25, %v570_v24 }
 0x407   :  { %v572_v26 = vpop.trf.xlu1 }
 0x40b   :  { %v573_v27 = vpop.trf.xlu1 }
 0x40c   :  { %v583_v38 = vpack.c.bf16 %v573_v27, %v572_v26 }
 0x40f   :  { %v574_v30 = vpop.trf.xlu1 }
 0x413   :  { %v575_v32 = vpop.trf.xlu1 }
 0x414   :  { %v584_v37 = vpack.c.bf16 %v575_v32, %v574_v30  ;;  %v3230_v32 = vld [vmem:[%s4476_s8 + $0x8] sm:$0xff]  }
 0x415   :  { %2957 = vmatpush3.bf16.msra.mxu0 %v3230_v32 }
 0x416   :  { %2958 = vmatprep.subr.bf16.mxu0 %v3422_v2 }
 0x417   :  { %v576_v33 = vpop.trf.xlu1 }
 0x41b   :  { %v577_v35 = vpop.trf.xlu1 }
 0x41c   :  { %v585_v36 = vpack.c.bf16 %v577_v35, %v576_v33  ;;  %v3231_v33 = vld [vmem:[%s4476_s8] sm:$0xff]  }
 0x41d   :  { %2959 = vmatpush3.bf16.msra.mxu0 %v3231_v33 }
 0x41e   :  { %2894 = vmatpush3.bf16.msra.mxu1 %v585_v36  ;;  %2984 = vmatprep.subr.bf16.mxu0 %v3422_v2 }
 0x41f   :  { %2895 = vmatprep.subr.bf16.mxu1 %v3422_v2 }
 0x422   :  { %2896 = vmatpush3.bf16.msra.mxu1 %v584_v37 }
 0x423   :  { %2897 = vmatprep.subr.bf16.mxu1 %v3422_v2 }
 0x426   :  { %2898 = vmatpush3.bf16.msra.mxu1 %v583_v38 }
 0x427   :  { %2899 = vmatprep.subr.bf16.mxu1 %v3422_v2 }
 0x42a   :  { %2900 = vmatpush3.bf16.msra.mxu1 %v582_v39 }
 0x42b   :  { %2901 = vmatprep.subr.bf16.mxu1 %v3422_v2 }
 0x42e   :  { %2902 = vmatpush3.bf16.msra.mxu1 %v581_v40  ;;  %v3901_v40 = vsub.s32 3, %v3659_v63 }
 0x42f   :  { %2903 = vmatprep.subr.bf16.mxu1 %v3422_v2 }
 0x432   :  { %2904 = vmatpush3.bf16.msra.mxu1 %v580_v44  ;;  %v794_v44 = vrot.slane %v3687_v17, %v3901_v40 }
 0x433   :  { %2905 = vmatprep.subr.bf16.mxu1 %v3422_v2 }
 0x436   :  { %2906 = vmatpush3.bf16.msra.mxu1 %v579_v12  ;;  %v3838_v12 = vld [vmem:[%s4474_s6] sm:$0xff] }
 0x437   :  { %2907 = vmatprep.subr.bf16.mxu1 %v3422_v2 }
 0x43a   :  { %2908 = vmatpush3.bf16.msra.mxu1 %v578_v9  ;;  %v3815_v9 = vld [vmem:[%s4474_s6 + $0x18] sm:$0xff]  ;;  %s2696_s6 = sld [smem:[#allocation6 + $0x2]] }
 0x43b   :  { %2913 = vmatprep.subr.mxu1 %v3789_v4 }
 0x43d   :  { %2910 = vmatmul.mubr.bf16.vlgmr.msra.gmra.mxu1 %v545_v54 }
 0x43e   :  { %2914 = vmatpush3.msra.mxu1 %v3789_v4 }
 0x43f   :  { %2915 = vmatprep.subr.mxu1 %v3796_v5 }
 0x440   :  { %2916 = vmatpush3.msra.mxu1 %v3796_v5 }
 0x441   :  { %2917 = vmatprep.subr.mxu1 %v3803_v6 }
 0x442   :  { %2918 = vmatpush3.msra.mxu1 %v3803_v6 }
 0x443   :  { %2919 = vmatprep.subr.mxu1 %v3808_v8 }
 0x444   :  { %2920 = vmatpush3.msra.mxu1 %v3808_v8 }
 0x445   :  { %2921 = vmatprep.subr.mxu1 %v3815_v9 }
 0x446   :  { %2922 = vmatpush3.msra.mxu1 %v3815_v9 }
 0x447   :  { %2923 = vmatprep.subr.mxu1 %v3822_v10 }
 0x448   :  { %2924 = vmatpush3.msra.mxu1 %v3822_v10 }
 0x449   :  { %2925 = vmatprep.subr.mxu1 %v3829_v11 }
 0x44a   :  { %2926 = vmatpush3.msra.mxu1 %v3829_v11 }
 0x44b   :  { %2927 = vmatprep.subr.mxu1 %v3838_v12 }
 0x44c   :  { %2928 = vmatpush3.msra.mxu1 %v3838_v12 }
 0x44d   :  { %2932 = vmatprep.subr.bf16.mxu1 %v3422_v2 }
 0x4fd   :  { %v620_v46 = vpop.f32.mrf.mxu1 }
 0x4fe   :  { %v621_v47 = vadd.f32 %v620_v46, %v3775_v45 }
 0x4ff   :  { %v2911_v53 = vpop.f32.mrf.mxu1 }
 0x500   :  { %v628_v60 = vsel %vm627_vm4, %v621_v47, -inf }
 0x501   :  { %629 = vmax.xlane.f32.xlu0 %v628_v60  ;;  %v623_v61 = vpop.f32.mrf.mxu1 }
 0x502   :  { %v624_v54 = vadd.f32 %v623_v61, %v3781_v58 }
 0x503   :  { %v2912_v62 = vpop.f32.mrf.mxu1 }
 0x504   :  { %v631_v3 = vsel %vm627_vm4, %v624_v54, -inf }
 0x505   :  { %632 = vmax.xlane.f32.xlu0 %v631_v3 }
 0x58a   :  { %v630_v16 = vpop.xlane.xlu0 %629 }
 0x58b   :  { %v634_v19 = vsub.f32 %v621_v47, %v630_v16  ;;  %v3232_v16 = vld [vmem:[%s4477_s9 + $0x38] sm:$0xff]  }
 0x58d   :  { %v636_v22 = vmul.f32 1.442695, %v634_v19 }
 0x58e   :  { %v633_v23 = vpop.xlane.xlu0 %632 }
 0x58f   :  { %3324 = vpow2.f32 %v636_v22  ;;  %v635_v24 = vsub.f32 %v624_v54, %v633_v23 }
 0x591   :  { %v638_v25 = vmul.f32 1.442695, %v635_v24 }
 0x593   :  { %3326 = vpow2.f32 %v638_v25 }
 0x59c   :  { %v3325_v26 = vpop.eup %3324 }
 0x59d   :  { %2929 = vmatprep.mubr.msk.f32.mxu1 %vm627_vm4, %v3325_v26 }
 0x5a0   :  { %v3327_v27 = vpop.eup %3326 }
 0x5a1   :  { %2930 = vmatmul.mubr.msk.f32.vlgmr.msra.gmra.mxu1 %vm627_vm4, %v3327_v27 }
 0x5a2   :  { %2933 = vmatpush3.bf16.msra.mxu1 %v729_v59  ;;  %2940 = vmatprep.mubr.msk.bf16.mxu1 %vm3423_vm0, %v3422_v2 }
 0x5a3   :  { %2934 = vmatprep.subr.bf16.mxu1 %v3422_v2 }
 0x5a6   :  { %2935 = vmatpush3.bf16.msra.mxu1 %v728_v55 }
 0x5a7   :  { %2936 = vmatprep.subr.bf16.mxu1 %v3422_v2 }
 0x5aa   :  { %2937 = vmatpush3.bf16.msra.mxu1 %v727_v56 }
 0x5ab   :  { %2938 = vmatprep.subr.bf16.mxu1 %v3422_v2 }
 0x5ae   :  { %2939 = vmatpush3.bf16.msra.mxu1 %v726_v57 }
 0x5af   :  { %2964 = vmatprep.subr.bf16.mxu1 %v3422_v2 }
 0x661   :  { %v2931_v50 = vpop.f32.mrf.mxu1 }
 0x662   :  { %3328 = vrcp.f32 %v2931_v50 }
 0x663   :  { %v712_v52 = vpop.f32.mrf.mxu1 }
 0x664   :  { %3330 = vrcp.f32 %v712_v52 }
 0x66f   :  { %v3329_v55 = vpop.eup %3328 }
 0x670   :  { %v724_v59 = vmul.f32 %v3329_v55, %v3327_v27 }
 0x671   :  { %v3331_v56 = vpop.eup %3330 }
 0x672   :  { %v723_v57 = vmul.f32 %v3331_v56, %v3325_v26 }
 0x674   :  { %v725_v30 = vpack.c.bf16 %v724_v59, %v723_v57 }
 0x676   :  { %2941 = vmatmul.mubr.msk.bf16.vlgmr.msra.gmra.mxu1 %vm627_vm4, %v725_v30  ;;  %v3939_v30 = vsub.s32 4, %v3659_v63 }
 0x677   :  { %2980 = vmatprep.mubr.msk.bf16.mxu1 %vm3423_vm0, %v3422_v2  ;;  %2965 = vmatpush3.bf16.msra.mxu1 %v3232_v16  ;;  %v3246_v16 = vld [vmem:[%s4478_s10 + $0x8] sm:$0xff]  }
 0x678   :  { %2966 = vmatprep.subr.bf16.mxu1 %v3422_v2 }
 0x736   :  { %v767_v35 = vpop.f32.mrf.mxu1 }
 0x738   :  { %v2942_v36 = vpop.f32.mrf.mxu1 }
 0x739   :  { %v3944_v36 = vsub.s32 5, %v3659_v63  ;;  %v3240_v63 = vld [vmem:[%s4478_s10 + $0x38] sm:$0xff]  }
 0x73a   :  { %v770_v37 = vpop.f32.mrf.mxu1 }
 0x73b   :  { %v774_v38 = vpack.c.bf16 %v770_v37, %v767_v35  ;;  %v911_v35 = vrot.slane %v3687_v17, %v3939_v30 }
 0x73c   :  { %v2943_v39 = vpop.f32.mrf.mxu1 }
 0x73d   :  { %2961 = vmatmul.mubr.bf16.vlgmr.msra.gmra.mxu0 %v774_v38 }
 0x73e   :  { %3000 = vmatprep.mubr.msk.bf16.mxu0 %vm3423_vm0, %v3422_v2  ;;  %2985 = vmatpush3.bf16.msra.mxu0 %v3240_v63 }
 0x73f   :  { %2986 = vmatprep.subr.bf16.mxu0 %v3422_v2 }
 0x7fd   :  { %v877_v46 = vpop.f32.mrf.mxu0 }
 0x7fe   :  { %v878_v47 = vadd.f32 %v877_v46, %v794_v44 }
 0x7ff   :  { %v2962_v53 = vpop.f32.mrf.mxu0 }
 0x800   :  { %v884_v60 = vadd.f32 %v878_v47, %v3674_v13 }
 0x801   :  { %v880_v61 = vpop.f32.mrf.mxu0 }
 0x802   :  { %v881_v54 = vadd.f32 %v880_v61, %v794_v44  ;;  %886 = vadd.xlane.f32.xlu0 %v884_v60  ;;  %v917_v44 = vrot.slane %v3687_v17, %v3944_v36  ;;  %v3241_v61 = vld [vmem:[%s4478_s10 + $0x30] sm:$0xff]  }
 0x803   :  { %v2963_v62 = vpop.f32.mrf.mxu0  ;;  %2987 = vmatpush3.bf16.msra.mxu0 %v3241_v61 }
 0x804   :  { %v885_v3 = vadd.f32 %v881_v54, %v3676_v15  ;;  %v3233_v15 = vld [vmem:[%s4477_s9 + $0x30] sm:$0xff]   ;;  %2988 = vmatprep.subr.bf16.mxu0 %v3422_v2  ;;  %v3242_v54 = vld [vmem:[%s4478_s10 + $0x28] sm:$0xff]   ;;  %v3244_v62 = vld [vmem:[%s4478_s10 + $0x18] sm:$0xff]  }
 0x805   :  { %2967 = vmatpush3.bf16.msra.mxu1 %v3233_v15 }
 0x806   :  { %888 = vadd.xlane.f32.xlu0 %v885_v3  ;;  %2968 = vmatprep.subr.bf16.mxu1 %v3422_v2 }
 0x807   :  { %2989 = vmatpush3.bf16.msra.mxu0 %v3242_v54 }
 0x808   :  { %2990 = vmatprep.subr.bf16.mxu0 %v3422_v2 }
 0x809   :  { %2969 = vmatpush3.bf16.msra.mxu1 %v3234_v51 }
 0x80a   :  { %2970 = vmatprep.subr.bf16.mxu1 %v3422_v2 }
 0x80d   :  { %2971 = vmatpush3.bf16.msra.mxu1 %v3235_v43 }
 0x80e   :  { %2972 = vmatprep.subr.bf16.mxu1 %v3422_v2 }
 0x811   :  { %2973 = vmatpush3.bf16.msra.mxu1 %v3236_v42 }
 0x812   :  { %2974 = vmatprep.subr.bf16.mxu1 %v3422_v2 }
 0x815   :  { %2975 = vmatpush3.bf16.msra.mxu1 %v3237_v41 }
 0x816   :  { %2976 = vmatprep.subr.bf16.mxu1 %v3422_v2 }
 0x819   :  { %2977 = vmatpush3.bf16.msra.mxu1 %v3238_v48 }
 0x81a   :  { %2978 = vmatprep.subr.bf16.mxu1 %v3422_v2 }
 0x81d   :  { %2979 = vmatpush3.bf16.msra.mxu1 %v3239_v49 }
 0x88b   :  { %v887_v19 = vpop.xlane.xlu0 %886 }
 0x88c   :  { %v890_v22 = vmul.f32 0.0078125, %v887_v19  ;;  %v3247_v19 = vld [vmem:[%s4478_s10] sm:$0xff]  }
 0x88e   :  { %v892_v23 = vsub.f32 %v884_v60, %v890_v22  ;;  %v940_v22 = vrot.slane %v3687_v17, %v3695_v20 }
 0x88f   :  { %v889_v24 = vpop.xlane.xlu0 %888 }
 0x890   :  { %v891_v25 = vmul.f32 0.0078125, %v889_v24  ;;  %v894_v13 = vmul.f32 %v892_v23, %v892_v23 }
 0x892   :  { %v893_v26 = vsub.f32 %v885_v3, %v891_v25  ;;  %896 = vadd.xlane.f32.xlu0 %v894_v13  ;;  %v3245_v3 = vld [vmem:[%s4478_s10 + $0x10] sm:$0xff]  }
 0x894   :  { %v895_v27 = vmul.f32 %v893_v26, %v893_v26 }
 0x896   :  { %898 = vadd.xlane.f32.xlu0 %v895_v27 }
 0x91b   :  { %v897_v50 = vpop.xlane.xlu0 %896 }
 0x91c   :  { %v900_v52 = vmul.f32 0.0078125, %v897_v50 }
 0x91e   :  { %v902_v55 = vadd.f32 1e-12, %v900_v52 }
 0x91f   :  { %v899_v56 = vpop.xlane.xlu0 %898 }
 0x920   :  { %3332 = vrsqrt.f32 %v902_v55  ;;  %v901_v57 = vmul.f32 0.0078125, %v899_v56 }
 0x922   :  { %v903_v59 = vadd.f32 1e-12, %v901_v57 }
 0x924   :  { %3334 = vrsqrt.f32 %v903_v59 }
 0x92d   :  { %v3333_v32 = vpop.eup %3332 }
 0x92e   :  { %v906_v33 = vmul.f32 %v3333_v32, %v892_v23 }
 0x930   :  { %v912_v39 = vmul.f32 %v911_v35, %v906_v33 }
 0x931   :  { %v3335_v37 = vpop.eup %3334 }
 0x932   :  { %v907_v38 = vmul.f32 %v3335_v37, %v893_v26  ;;  %v3948_v47 = vadd.f32 %v917_v44, %v912_v39 }
 0x934   :  { %v913_v46 = vmul.f32 %v911_v35, %v907_v38 }
 0x936   :  { %v3950_v53 = vadd.f32 %v917_v44, %v913_v46  ;;  %v1068_v44 = vrot.slane %v3687_v17, %v3698_v21  ;;  %v3250_v17 = vld [vmem:[%s4475_s7 + $0x16c] ss:$12 sps:$4 sm:$0xff]  }
 0x937   :  { %1359 = vmatprep.subr.bf16.mxu1 %v3250_v17 }
 0x938   :  { %v920_v60 = vpack.c.bf16 %v3950_v53, %v3948_v47 }
 0x93a   :  { %2981 = vmatmul.mubr.bf16.vlgmr.msra.gmra.mxu1 %v920_v60 }
 0x93b   :  { %1391 = vmatprep.mubr.bf16.mxu1 %v3421_v1  ;;  %v3243_v1 = vld [vmem:[%s4478_s10 + $0x20] sm:$0xff]  }
 0x93c   :  { %2991 = vmatpush3.bf16.msra.mxu0 %v3243_v1 }
 0x93d   :  { %2992 = vmatprep.subr.bf16.mxu0 %v3422_v2 }
 0x940   :  { %2993 = vmatpush3.bf16.msra.mxu0 %v3244_v62 }
 0x941   :  { %2994 = vmatprep.subr.bf16.mxu0 %v3422_v2 }
 0x944   :  { %2995 = vmatpush3.bf16.msra.mxu0 %v3245_v3 }
 0x945   :  { %2996 = vmatprep.subr.bf16.mxu0 %v3422_v2 }
 0x948   :  { %2997 = vmatpush3.bf16.msra.mxu0 %v3246_v16  ;;  %v3248_v16 = vld [vmem:[%s4475_s7 + $0x168] ss:$12 sps:$4 sm:$0xff]  }
 0x949   :  { %2998 = vmatprep.subr.bf16.mxu0 %v3422_v2  ;;  %1360 = vmatpush1.bf16.msra.mxu1 %v3248_v16 }
 0x94c   :  { %2999 = vmatpush3.bf16.msra.mxu0 %v3247_v19  ;;  %v3251_v19 = vld [vmem:[%s4475_s7 + $0x170] ss:$12 sps:$4 sm:$0xff]  }
 0x94d   :  { %3004 = vmatprep.subr.bf16.mxu0 %v3422_v2 }
 0x9fa   :  { %v1023_v23 = vpop.f32.mrf.mxu1 }
 0x9fb   :  { %v1024_v24 = vadd.f32 %v1023_v23, %v940_v22 }
 0x9fc   :  { %v2982_v25 = vpop.f32.mrf.mxu1 }
 0x9fd   :  { %v1032_v13 = vmul.f32 0.044715, %v1024_v24  ;;  %v1030_v32 = vmul.f32 0.5, %v1024_v24 }
 0x9fe   :  { %v1026_v26 = vpop.f32.mrf.mxu1 }
 0x9ff   :  { %v1034_v27 = vmul.f32 %v1032_v13, %v1024_v24  ;;  %v1027_v15 = vadd.f32 %v1026_v26, %v940_v22 }
 0xa00   :  { %v2983_v51 = vpop.f32.mrf.mxu1 }
 0xa01   :  { %v1036_v43 = vmul.f32 %v1034_v27, %v1024_v24  ;;  %v1033_v42 = vmul.f32 0.044715, %v1027_v15  ;;  %v1031_v33 = vmul.f32 0.5, %v1027_v15  ;;  %v3254_v27 = vld [vmem:[%s4475_s7 + $0x154] ss:$12 sps:$4 sm:$0xff]  }
 0xa02   :  { %v3255_v51 = vld [vmem:[%s4475_s7 + $0x158] ss:$12 sps:$4 sm:$0xff]   ;;  %1361 = vmatprep.subr.bf16.mxu1 %v3254_v27 }
 0xa03   :  { %v1038_v41 = vadd.f32 %v1036_v43, %v1024_v24  ;;  %v1035_v48 = vmul.f32 %v1033_v42, %v1027_v15  ;;  %v3258_v43 = vld [vmem:[%s4475_s7 + $0x13c] ss:$12 sps:$4 sm:$0xff]   ;;  %v3256_v42 = vld [vmem:[%s4475_s7 + $0x138] ss:$12 sps:$4 sm:$0xff]  }
 0xa05   :  { %v1040_v49 = vmul.f32 0.7978846, %v1038_v41  ;;  %v1037_v50 = vmul.f32 %v1035_v48, %v1027_v15  ;;  %v3259_v41 = vld [vmem:[%s4475_s7 + $0x140] ss:$12 sps:$4 sm:$0xff]  }
 0xa06   :  { %v3260_v48 = vld [vmem:[%s4475_s7 + $0x120] ss:$12 sps:$4 sm:$0xff]  }
 0xa07   :  { %3336 = vtanh.f32 %v1040_v49  ;;  %v1039_v52 = vadd.f32 %v1037_v50, %v1027_v15  ;;  %v3252_v15 = vld [vmem:[%s4475_s7 + $0x150] ss:$12 sps:$4 sm:$0xff]   ;;  %v3263_v50 = vld [vmem:[%s4475_s7 + $0x128] ss:$12 sps:$4 sm:$0xff]  }
 0xa08   :  { %1362 = vmatpush1.bf16.msra.mxu1 %v3252_v15  ;;  %v3262_v49 = vld [vmem:[%s4475_s7 + $0x124] ss:$12 sps:$4 sm:$0xff]  }
 0xa09   :  { %v1041_v55 = vmul.f32 0.7978846, %v1039_v52  ;;  %1363 = vmatprep.subr.bf16.mxu1 %v3258_v43  ;;  %v3266_v52 = vld [vmem:[%s4475_s7 + $0x10c] ss:$12 sps:$4 sm:$0xff]  }
 0xa0b   :  { %3338 = vtanh.f32 %v1041_v55  ;;  %v3264_v55 = vld [vmem:[%s4475_s7 + $0x108] ss:$12 sps:$4 sm:$0xff]  }
 0xa0c   :  { %1364 = vmatpush1.bf16.msra.mxu1 %v3256_v42 }
 0xa0d   :  { %1365 = vmatprep.subr.bf16.mxu1 %v3262_v49 }
 0xa10   :  { %1366 = vmatpush1.bf16.msra.mxu1 %v3260_v48 }
 0xa11   :  { %1367 = vmatprep.subr.bf16.mxu1 %v3266_v52 }
 0xa14   :  { %v3337_v56 = vpop.eup %3336  ;;  %1368 = vmatpush1.bf16.msra.mxu1 %v3264_v55 }
 0xa15   :  { %v1044_v57 = vadd.f32 1.0, %v3337_v56  ;;  %v3267_v56 = vld [vmem:[%s4475_s7 + $0x110] ss:$12 sps:$4 sm:$0xff]  }
 0xa17   :  { %v1046_v37 = vmul.f32 %v1044_v57, %v1030_v32  ;;  %v3270_v57 = vld [vmem:[%s4475_s7 + $0xf4] ss:$12 sps:$4 sm:$0xff]   ;;  %v3271_v32 = vld [vmem:[%s4475_s7 + $0xf8] ss:$12 sps:$4 sm:$0xff]  }
 0xa18   :  { %v3339_v59 = vpop.eup %3338  ;;  %1369 = vmatprep.subr.bf16.mxu1 %v3270_v57 }
 0xa19   :  { %v1045_v35 = vadd.f32 1.0, %v3339_v59  ;;  %v3268_v59 = vld [vmem:[%s4475_s7 + $0xf0] ss:$12 sps:$4 sm:$0xff]  }
 0xa1a   :  { %1370 = vmatpush1.bf16.msra.mxu1 %v3268_v59 }
 0xa1b   :  { %v1047_v38 = vmul.f32 %v1045_v35, %v1031_v33  ;;  %v3274_v33 = vld [vmem:[%s4475_s7 + $0xdc] ss:$12 sps:$4 sm:$0xff]   ;;  %v3272_v35 = vld [vmem:[%s4475_s7 + $0xd8] ss:$12 sps:$4 sm:$0xff]  }
 0xa1c   :  { %1371 = vmatprep.subr.bf16.mxu1 %v3274_v33 }
 0xa1d   :  { %v1048_v39 = vpack.c.bf16 %v1047_v38, %v1046_v37  ;;  %v3275_v37 = vld [vmem:[%s4475_s7 + $0xe0] ss:$12 sps:$4 sm:$0xff]   ;;  %v3278_v38 = vld [vmem:[%s4475_s7 + $0xc4] ss:$12 sps:$4 sm:$0xff]  }
 0xa1e   :  { %1372 = vmatpush1.bf16.msra.mxu1 %v3272_v35 }
 0xa1f   :  { %3001 = vmatmul.mubr.bf16.vlgmr.msra.gmra.mxu0 %v1048_v39  ;;  %v3276_v39 = vld [vmem:[%s4475_s7 + $0xc0] ss:$12 sps:$4 sm:$0xff]   ;;  %1373 = vmatprep.subr.bf16.mxu1 %v3278_v38 }
 0xa20   :  { %3020 = vmatprep.mubr.msk.bf16.mxu0 %vm3423_vm0, %v3422_v2  ;;  %3005 = vmatpush3.bf16.msra.mxu0 %v3251_v19 }
 0xa21   :  { %3006 = vmatprep.subr.bf16.mxu0 %v3422_v2 }
 0xa22   :  { %1374 = vmatpush1.bf16.msra.mxu1 %v3276_v39 }
 0xa23   :  { %3024 = vmatprep.subr.bf16.mxu1 %v3422_v2 }
 0xa24   :  { %3007 = vmatpush3.bf16.msra.mxu0 %v3255_v51 }
 0xa25   :  { %3008 = vmatprep.subr.bf16.mxu0 %v3422_v2 }
 0xa28   :  { %3009 = vmatpush3.bf16.msra.mxu0 %v3259_v41 }
 0xa29   :  { %3010 = vmatprep.subr.bf16.mxu0 %v3422_v2 }
 0xa2c   :  { %3011 = vmatpush3.bf16.msra.mxu0 %v3263_v50 }
 0xa2d   :  { %3012 = vmatprep.subr.bf16.mxu0 %v3422_v2 }
 0xa30   :  { %3013 = vmatpush3.bf16.msra.mxu0 %v3267_v56 }
 0xa31   :  { %3014 = vmatprep.subr.bf16.mxu0 %v3422_v2 }
 0xa34   :  { %3015 = vmatpush3.bf16.msra.mxu0 %v3271_v32 }
 0xa35   :  { %3016 = vmatprep.subr.bf16.mxu0 %v3422_v2 }
 0xa38   :  { %3017 = vmatpush3.bf16.msra.mxu0 %v3275_v37 }
 0xa39   :  { %3018 = vmatprep.subr.bf16.mxu0 %v3422_v2 }
 0xadf   :  { %v1151_v46 = vpop.f32.mrf.mxu0 }
 0xae0   :  { %v1152_v60 = vadd.f32 %v1151_v46, %v1068_v44 }
 0xae1   :  { %v3002_v63 = vpop.f32.mrf.mxu0 }
 0xae2   :  { %v1158_v61 = vadd.f32 %v1152_v60, %v3948_v47 }
 0xae3   :  { %v1154_v54 = vpop.f32.mrf.mxu0 }
 0xae4   :  { %v1155_v1 = vadd.f32 %v1154_v54, %v1068_v44  ;;  %1160 = vadd.xlane.f32.xlu0 %v1158_v61  ;;  %v3279_v44 = vld [vmem:[%s4475_s7 + $0xc8] ss:$12 sps:$4 sm:$0xff]  }
 0xae5   :  { %v3003_v62 = vpop.f32.mrf.mxu0  ;;  %3019 = vmatpush3.bf16.msra.mxu0 %v3279_v44 }
 0xae6   :  { %v1159_v3 = vadd.f32 %v1155_v1, %v3950_v53  ;;  %3044 = vmatprep.subr.mxu0 %v3789_v4  ;;  %v247_v62 = vld [vmem:[%s4481_s13 + $0x8] sm:$0x3] }
 0xae7   :  { %v1185_v17 = vrot.slane %v247_v62, %v3662_v0 }
 0xae8   :  { %1162 = vadd.xlane.f32.xlu0 %v1159_v3 }
 0xb6d   :  { %v1161_v47 = vpop.xlane.xlu0 %1160 }
 0xb6e   :  { %v1164_v53 = vmul.f32 0.0078125, %v1161_v47 }
 0xb70   :  { %v4005_v22 = vsub.f32 %v1158_v61, %v1164_v53 }
 0xb71   :  { %v1163_v23 = vpop.xlane.xlu0 %1162 }
 0xb72   :  { %v1165_v24 = vmul.f32 0.0078125, %v1163_v23  ;;  %v1168_v25 = vmul.f32 %v4005_v22, %v4005_v22  ;;  %v1191_v23 = vrot.slane %v247_v62, %v3670_v7 }
 0xb74   :  { %v4009_v13 = vsub.f32 %v1159_v3, %v1165_v24  ;;  %1170 = vadd.xlane.f32.xlu0 %v1168_v25 }
 0xb76   :  { %v1169_v26 = vmul.f32 %v4009_v13, %v4009_v13 }
 0xb78   :  { %1172 = vadd.xlane.f32.xlu0 %v1169_v26 }
 0xbfd   :  { %v1171_v46 = vpop.xlane.xlu0 %1170 }
 0xbfe   :  { %v1174_v60 = vmul.f32 0.0078125, %v1171_v46 }
 0xc00   :  { %v1176_v63 = vadd.f32 1e-12, %v1174_v60 }
 0xc01   :  { %v1173_v61 = vpop.xlane.xlu0 %1172 }
 0xc02   :  { %3340 = vrsqrt.f32 %v1176_v63  ;;  %v1175_v54 = vmul.f32 0.0078125, %v1173_v61 }
 0xc04   :  { %v1177_v1 = vadd.f32 1e-12, %v1175_v54 }
 0xc06   :  { %3342 = vrsqrt.f32 %v1177_v1 }
 0xc0f   :  { %v3341_v3 = vpop.eup %3340 }
 0xc10   :  { %v1180_v16 = vmul.f32 %v3341_v3, %v4005_v22 }
 0xc12   :  { %v1186_v53 = vmul.f32 %v1185_v17, %v1180_v16 }
 0xc13   :  { %v3343_v19 = vpop.eup %3342 }
 0xc14   :  { %v1181_v47 = vmul.f32 %v3343_v19, %v4009_v13  ;;  %v4091_v25 = vadd.f32 %v1191_v23, %v1186_v53 }
 0xc16   :  { %v1187_v24 = vmul.f32 %v1185_v17, %v1181_v47 }
 0xc18   :  { %v4093_v26 = vadd.f32 %v1191_v23, %v1187_v24 }
 0xc1a   :  { %v1197_v27 = vpack.c.bf16 %v4093_v26, %v4091_v25 }
 0xc1c   :  { %1392 = vmatmul.mubr.bf16.vlgmr.msra.gmra.mxu1 %v1197_v27  ;;  %3021 = vmatmul.mubr.bf16.vlgmr.msra.gmra.mxu0 %v1197_v27 }
 0xc1d   :  { %3040 = vmatprep.mubr.msk.bf16.mxu1 %vm3423_vm0, %v3422_v2  ;;  %3045 = vmatpush3.msra.mxu0 %v3789_v4  ;;  %v4118_v4 = vld [vmem:[%s4481_s13 + $0x10] sm:$0xff] }
 0xc1e   :  { %3046 = vmatprep.subr.mxu0 %v3796_v5 }
 0xc1f   :  { %3047 = vmatpush3.msra.mxu0 %v3796_v5  ;;  %v1446_v5 = vrot.slane %v4118_v4, %v3662_v0 }
 0xc20   :  { %3048 = vmatprep.subr.mxu0 %v3803_v6 }
 0xc21   :  { %3049 = vmatpush3.msra.mxu0 %v3803_v6  ;;  %v1460_v6 = vrot.slane %v4118_v4, %v3690_v18 }
 0xc22   :  { %3050 = vmatprep.subr.mxu0 %v3808_v8 }
 0xc23   :  { %3051 = vmatpush3.msra.mxu0 %v3808_v8 }
 0xc24   :  { %3052 = vmatprep.subr.mxu0 %v3815_v9 }
 0xc25   :  { %3053 = vmatpush3.msra.mxu0 %v3815_v9 }
 0xc26   :  { %3054 = vmatprep.subr.mxu0 %v3822_v10 }
 0xc27   :  { %3055 = vmatpush3.msra.mxu0 %v3822_v10  ;;  %v1454_v10 = vrot.slane %v4118_v4, %v3670_v7 }
 0xc28   :  { %3056 = vmatprep.subr.mxu0 %v3829_v11 }
 0xc29   :  { %3057 = vmatpush3.msra.mxu0 %v3829_v11 }
 0xc2a   :  { %3058 = vmatprep.subr.mxu0 %v3838_v12 }
 0xc2b   :  { %3059 = vmatpush3.msra.mxu0 %v3838_v12 }
 0xc2c   :  { %3075 = vmatprep.subr.bf16.mxu0 %v3422_v2 }
 0xcdc   :  { %v1393_v8 = vpop.f32.mrf.mxu1  ;;  %v1436_v9 = vpop.f32.mrf.mxu0 }
 0xcdd   :  { %v1447_v11 = vadd.f32 %v1446_v5, %v1393_v8  ;;  %v1461_v12 = vadd.f32 %v1460_v6, %v1436_v9 }
 0xcde   :  { %v1395_v22 = vpop.f32.mrf.mxu1  ;;  %v3022_v13 = vpop.f32.mrf.mxu0 }
 0xcdf   :  { %v1455_v15 = vadd.f32 %v1454_v10, %v1395_v22  ;;  %v4126_v42 = vmul.f32 0.17677669, %v1447_v11  ;;  %v4129_v49 = vmul.f32 %v1461_v12, %v3708_v28  ;;  %v4132_v50 = vmul.f32 %v1461_v12, %v3711_v29 }
 0xce0   :  { %v1397_v51 = vpop.f32.mrf.mxu1  ;;  %v1439_v43 = vpop.f32.mrf.mxu0  ;;  %v4135_v52 = vmul.f32 %v1461_v12, %v3714_v31  ;;  %v4150_v37 = vmul.f32 %v1461_v12, %v3717_v34 }
 0xce1   :  { %v1448_v41 = vadd.f32 %v1446_v5, %v1397_v51  ;;  %v1462_v48 = vadd.f32 %v1460_v6, %v1439_v43  ;;  %v1463_v57 = vmul.f32 %v1455_v15, %v3708_v28  ;;  %v1465_v1 = vmul.f32 %v1455_v15, %v3711_v29 }
 0xce2   :  { %v1399_v55 = vpop.f32.mrf.mxu1  ;;  %v3023_v56 = vpop.f32.mrf.mxu0  ;;  %v1467_v3 = vmul.f32 %v1455_v15, %v3714_v31  ;;  %v1469_v17 = vmul.f32 %v1455_v15, %v3717_v34 }
 0xce3   :  { %v4138_v59 = vmul.f32 0.17677669, %v1448_v41  ;;  %v4141_v32 = vmul.f32 %v1462_v48, %v3708_v28  ;;  %v4144_v33 = vmul.f32 %v1462_v48, %v3711_v29  ;;  %v4147_v35 = vmul.f32 %v1462_v48, %v3714_v31  ;;  %1480 = vxpose.xlu0.b32.start [1/8] (short) %v1463_v57, 128 }
 0xce4   :  { %v4153_v38 = vmul.f32 %v1462_v48, %v3717_v34  ;;  %v1456_v39 = vadd.f32 %v1454_v10, %v1399_v55 }
 0xce5   :  { %v1479_v44 = vpack.c.bf16 %v4138_v59, %v4126_v42  ;;  %v1661_v46 = vpack.c.bf16 %v4147_v35, %v4135_v52  ;;  %v1660_v60 = vpack.c.bf16 %v4144_v33, %v4132_v50  ;;  %v1659_v63 = vpack.c.bf16 %v4141_v32, %v4129_v49 }
 0xce6   :  { %v1464_v61 = vmul.f32 %v1456_v39, %v3708_v28  ;;  %v1662_v54 = vpack.c.bf16 %v4153_v38, %v4150_v37  ;;  %v1466_v62 = vmul.f32 %v1456_v39, %v3711_v29  ;;  %v1468_v16 = vmul.f32 %v1456_v39, %v3714_v31 }
 0xce7   :  { %v1470_v28 = vmul.f32 %v1456_v39, %v3717_v34 }
 0xce8   :  { %1481 = vxpose.xlu0.b32.cont [2/8] (short) %v1464_v61, 128  ;;  %v3283_v61 = vld [vmem:[%s4476_s8 + $0x60] sm:$0xff]  }
 0xcec   :  { %1482 = vxpose.xlu0.b32.cont [3/8] (short) %v1465_v1, 128  ;;  %v3285_v1 = vld [vmem:[%s4476_s8 + $0x50] sm:$0xff]  }
 0xcf0   :  { %1483 = vxpose.xlu0.b32.cont [4/8] (short) %v1466_v62, 128 }
 0xcf4   :  { %1484 = vxpose.xlu0.b32.cont [5/8] (short) %v1467_v3, 128 }
 0xcf8   :  { %1485 = vxpose.xlu0.b32.cont [6/8] (short) %v1468_v16, 128 }
 0xcfc   :  { %1486 = vxpose.xlu0.b32.cont [7/8] (short) %v1469_v17, 128 }
 0xd00   :  { %1487 = vxpose.xlu0.b32.end [8/8] (short) %v1470_v28, 128 }
 0xd60   :  { %v1496_v19 = vpop.trf.xlu0 }
 0xd64   :  { %v1497_v47 = vpop.trf.xlu0 }
 0xd65   :  { %v1512_v53 = vpack.c.bf16 %v1497_v47, %v1496_v19 }
 0xd68   :  { %v1498_v23 = vpop.trf.xlu0 }
 0xd6c   :  { %v1499_v24 = vpop.trf.xlu0 }
 0xd6d   :  { %v1513_v27 = vpack.c.bf16 %v1499_v24, %v1498_v23  ;;  %v3287_v23 = vld [vmem:[%s4476_s8 + $0x40] sm:$0xff]  }
 0xd70   :  { %v1500_v29 = vpop.trf.xlu0 }
 0xd74   :  { %v1501_v5 = vpop.trf.xlu0 }
 0xd75   :  { %v1514_v48 = vpack.c.bf16 %v1501_v5, %v1500_v29 }
 0xd78   :  { %v1502_v6 = vpop.trf.xlu0 }
 0xd7c   :  { %v1503_v8 = vpop.trf.xlu0 }
 0xd7d   :  { %v1515_v41 = vpack.c.bf16 %v1503_v8, %v1502_v6  ;;  %v1728_v8 = vrot.slane %v4118_v4, %v3901_v40 }
 0xd80   :  { %v1504_v9 = vpop.trf.xlu0 }
 0xd84   :  { %v1505_v10 = vpop.trf.xlu0 }
 0xd85   :  { %v1516_v42 = vpack.c.bf16 %v1505_v10, %v1504_v9 }
 0xd88   :  { %v1506_v31 = vpop.trf.xlu0 }
 0xd8c   :  { %v1507_v11 = vpop.trf.xlu0 }
 0xd8d   :  { %v1517_v43 = vpack.c.bf16 %v1507_v11, %v1506_v31 }
 0xd90   :  { %v1508_v12 = vpop.trf.xlu0 }
 0xd94   :  { %v1509_v22 = vpop.trf.xlu0 }
 0xd95   :  { %v1518_v51 = vpack.c.bf16 %v1509_v22, %v1508_v12 }
 0xd98   :  { %v1510_v13 = vpop.trf.xlu0 }
 0xd9c   :  { %v1511_v15 = vpop.trf.xlu0 }
 0xd9d   :  { %v1519_v34 = vpack.c.bf16 %v1511_v15, %v1510_v13 }
 0xd9f   :  { %3025 = vmatpush3.bf16.msra.mxu1 %v1519_v34  ;;  %v3288_v34 = vld [vmem:[%s4477_s9 + $0x78] sm:$0xff]  }
 0xda0   :  { %3026 = vmatprep.subr.bf16.mxu1 %v3422_v2 }
 0xda3   :  { %3027 = vmatpush3.bf16.msra.mxu1 %v1518_v51 }
 0xda4   :  { %3028 = vmatprep.subr.bf16.mxu1 %v3422_v2 }
 0xda7   :  { %3029 = vmatpush3.bf16.msra.mxu1 %v1517_v43 }
 0xda8   :  { %3030 = vmatprep.subr.bf16.mxu1 %v3422_v2 }
 0xdab   :  { %3031 = vmatpush3.bf16.msra.mxu1 %v1516_v42 }
 0xdac   :  { %3032 = vmatprep.subr.bf16.mxu1 %v3422_v2 }
 0xdaf   :  { %3033 = vmatpush3.bf16.msra.mxu1 %v1515_v41 }
 0xdb0   :  { %3034 = vmatprep.subr.bf16.mxu1 %v3422_v2 }
 0xdb3   :  { %3035 = vmatpush3.bf16.msra.mxu1 %v1514_v48 }
 0xdb4   :  { %3036 = vmatprep.subr.bf16.mxu1 %v3422_v2 }
 0xdb7   :  { %3037 = vmatpush3.bf16.msra.mxu1 %v1513_v27 }
 0xdb8   :  { %3038 = vmatprep.subr.bf16.mxu1 %v3422_v2 }
 0xdbb   :  { %3039 = vmatpush3.bf16.msra.mxu1 %v1512_v53  ;;  %v3286_v53 = vld [vmem:[%s4476_s8 + $0x48] sm:$0xff]  }
 0xdbc   :  { %3063 = vmatprep.subr.bf16.mxu1 %v3422_v2 }
 0xdbe   :  { %3041 = vmatmul.mubr.bf16.vlgmr.msra.gmra.mxu1 %v1479_v44 }
 0xdbf   :  { %3064 = vmatpush3.bf16.msra.mxu1 %v1662_v54  ;;  %3071 = vmatprep.mubr.msk.bf16.mxu1 %vm3423_vm0, %v3422_v2  ;;  %v3284_v54 = vld [vmem:[%s4476_s8 + $0x58] sm:$0xff]  }
 0xdc0   :  { %3065 = vmatprep.subr.bf16.mxu1 %v3422_v2 }
 0xdc3   :  { %3066 = vmatpush3.bf16.msra.mxu1 %v1661_v46 }
 0xdc4   :  { %3067 = vmatprep.subr.bf16.mxu1 %v3422_v2 }
 0xdc7   :  { %3068 = vmatpush3.bf16.msra.mxu1 %v1660_v60  ;;  %v3281_v60 = vld [vmem:[%s4476_s8 + $0x70] sm:$0xff]  }
 0xdc8   :  { %3069 = vmatprep.subr.bf16.mxu1 %v3422_v2 }
 0xdcb   :  { %3070 = vmatpush3.bf16.msra.mxu1 %v1659_v63  ;;  %v3282_v63 = vld [vmem:[%s4476_s8 + $0x68] sm:$0xff]  }
 0xdcc   :  { %3095 = vmatprep.subr.bf16.mxu1 %v3422_v2 }
 0xe7e   :  { %v1554_v50 = vpop.f32.mrf.mxu1 }
 0xe7f   :  { %v1555_v52 = vadd.f32 %v1554_v50, %v3775_v45 }
 0xe80   :  { %v3042_v55 = vpop.f32.mrf.mxu1 }
 0xe81   :  { %v1561_v56 = vsel %vm627_vm4, %v1555_v52, -inf  ;;  %v3290_v55 = vld [vmem:[%s4477_s9 + $0x68] sm:$0xff]  }
 0xe82   :  { %1562 = vmax.xlane.f32.xlu1 %v1561_v56  ;;  %v1557_v57 = vpop.f32.mrf.mxu1  ;;  %v3291_v56 = vld [vmem:[%s4477_s9 + $0x60] sm:$0xff]  }
 0xe83   :  { %v1558_v59 = vadd.f32 %v1557_v57, %v3781_v58  ;;  %v3280_v58 = vld [vmem:[%s4476_s8 + $0x78] sm:$0xff]  }
 0xe84   :  { %v3043_v33 = vpop.f32.mrf.mxu1  ;;  %v3292_v57 = vld [vmem:[%s4477_s9 + $0x58] sm:$0xff]  }
 0xe85   :  { %v1564_v35 = vsel %vm627_vm4, %v1558_v59, -inf  ;;  %v3294_v33 = vld [vmem:[%s4477_s9 + $0x48] sm:$0xff]  }
 0xe86   :  { %1565 = vmax.xlane.f32.xlu0 %v1564_v35  ;;  %v3295_v35 = vld [vmem:[%s4477_s9 + $0x40] sm:$0xff]  }
 0xf0b   :  { %v1563_v37 = vpop.xlane.xlu1 %1562 }
 0xf0c   :  { %v1567_v38 = vsub.f32 %v1555_v52, %v1563_v37 }
 0xf0e   :  { %v1569_v49 = vmul.f32 1.442695, %v1567_v38 }
 0xf0f   :  { %v1566_v32 = vpop.xlane.xlu0 %1565 }
 0xf10   :  { %3344 = vpow2.f32 %v1569_v49  ;;  %v1568_v39 = vsub.f32 %v1558_v59, %v1566_v32  ;;  %v3293_v59 = vld [vmem:[%s4477_s9 + $0x50] sm:$0xff]  }
 0xf12   :  { %v1571_v44 = vmul.f32 1.442695, %v1568_v39 }
 0xf14   :  { %3346 = vpow2.f32 %v1571_v44 }
 0xf1d   :  { %v3345_v45 = vpop.eup %3344 }
 0xf1e   :  { %3060 = vmatprep.mubr.msk.f32.mxu0 %vm627_vm4, %v3345_v45 }
 0xf21   :  { %v3347_v46 = vpop.eup %3346 }
 0xf22   :  { %3061 = vmatmul.mubr.msk.f32.vlgmr.msra.gmra.mxu0 %vm627_vm4, %v3347_v46 }
 0xf23   :  { %3091 = vmatprep.mubr.msk.bf16.mxu0 %vm3423_vm0, %v3422_v2  ;;  %3076 = vmatpush3.bf16.msra.mxu0 %v3280_v58  ;;  %v1845_v58 = vrot.slane %v4118_v4, %v3939_v30 }
 0xf24   :  { %3077 = vmatprep.subr.bf16.mxu0 %v3422_v2 }
 0xf27   :  { %3078 = vmatpush3.bf16.msra.mxu0 %v3281_v60 }
 0xf28   :  { %3079 = vmatprep.subr.bf16.mxu0 %v3422_v2 }
 0xf2b   :  { %3080 = vmatpush3.bf16.msra.mxu0 %v3282_v63 }
 0xf2c   :  { %3081 = vmatprep.subr.bf16.mxu0 %v3422_v2 }
 0xf2f   :  { %3082 = vmatpush3.bf16.msra.mxu0 %v3283_v61 }
 0xf30   :  { %3083 = vmatprep.subr.bf16.mxu0 %v3422_v2 }
 0xf33   :  { %3084 = vmatpush3.bf16.msra.mxu0 %v3284_v54  ;;  %v1851_v54 = vrot.slane %v4118_v4, %v3944_v36 }
 0xf34   :  { %3085 = vmatprep.subr.bf16.mxu0 %v3422_v2 }
 0xf37   :  { %3086 = vmatpush3.bf16.msra.mxu0 %v3285_v1 }
 0xf38   :  { %3087 = vmatprep.subr.bf16.mxu0 %v3422_v2 }
 0xf3b   :  { %3088 = vmatpush3.bf16.msra.mxu0 %v3286_v53  ;;  %v3300_v53 = vld [vmem:[%s4478_s10 + $0x58] sm:$0xff]  }
 0xf3c   :  { %3089 = vmatprep.subr.bf16.mxu0 %v3422_v2 }
 0xf3f   :  { %3090 = vmatpush3.bf16.msra.mxu0 %v3287_v23  ;;  %v3301_v23 = vld [vmem:[%s4478_s10 + $0x50] sm:$0xff]  }
 0xf40   :  { %3115 = vmatprep.subr.bf16.mxu0 %v3422_v2 }
 0xfe2   :  { %v3062_v62 = vpop.f32.mrf.mxu0 }
 0xfe3   :  { %3348 = vrcp.f32 %v3062_v62 }
 0xfe4   :  { %v1645_v3 = vpop.f32.mrf.mxu0 }
 0xfe5   :  { %3350 = vrcp.f32 %v1645_v3 }
 0xff0   :  { %v3349_v16 = vpop.eup %3348 }
 0xff1   :  { %v1657_v19 = vmul.f32 %v3349_v16, %v3347_v46 }
 0xff2   :  { %v3351_v17 = vpop.eup %3350 }
 0xff3   :  { %v1656_v28 = vmul.f32 %v3351_v17, %v3345_v45  ;;  %v3296_v17 = vld [vmem:[%s4478_s10 + $0x78] sm:$0xff]  }
 0xff5   :  { %v1658_v47 = vpack.c.bf16 %v1657_v19, %v1656_v28  ;;  %v3297_v28 = vld [vmem:[%s4478_s10 + $0x70] sm:$0xff]   ;;  %v3298_v19 = vld [vmem:[%s4478_s10 + $0x68] sm:$0xff]  }
 0xff7   :  { %3072 = vmatmul.mubr.msk.bf16.vlgmr.msra.gmra.mxu1 %vm627_vm4, %v1658_v47  ;;  %v3299_v47 = vld [vmem:[%s4478_s10 + $0x60] sm:$0xff]  }
 0xff8   :  { %3111 = vmatprep.mubr.msk.bf16.mxu1 %vm3423_vm0, %v3422_v2  ;;  %3096 = vmatpush3.bf16.msra.mxu1 %v3288_v34 }
 0xff9   :  { %3097 = vmatprep.subr.bf16.mxu1 %v3422_v2 }
0x10b7   :  { %v1700_v24 = vpop.f32.mrf.mxu1 }
0x10b9   :  { %v3073_v27 = vpop.f32.mrf.mxu1 }
0x10ba   :  { %v3303_v27 = vld [vmem:[%s4478_s10 + $0x40] sm:$0xff]  }
0x10bb   :  { %v1703_v29 = vpop.f32.mrf.mxu1 }
0x10bc   :  { %v1707_v5 = vpack.c.bf16 %v1703_v29, %v1700_v24  ;;  %v3302_v24 = vld [vmem:[%s4478_s10 + $0x48] sm:$0xff]   ;;  %v1875_v29 = vrot.slane %v4118_v4, %v3695_v20 }
0x10bd   :  { %v3074_v6 = vpop.f32.mrf.mxu1 }
0x10be   :  { %3092 = vmatmul.mubr.bf16.vlgmr.msra.gmra.mxu0 %v1707_v5 }
0x10bf   :  { %3131 = vmatprep.mubr.msk.bf16.mxu0 %vm3423_vm0, %v3422_v2  ;;  %3116 = vmatpush3.bf16.msra.mxu0 %v3296_v17  ;;  %v3309_v17 = vld [vmem:[%s4479_s11 + $0x10] sm:$0xff]  }
0x10c0   :  { %3117 = vmatprep.subr.bf16.mxu0 %v3422_v2 }
0x10c3   :  { %3118 = vmatpush3.bf16.msra.mxu0 %v3297_v28  ;;  %v3310_v28 = vld [vmem:[%s4479_s11 + $0x8] sm:$0xff]  }
0x10c4   :  { %3119 = vmatprep.subr.bf16.mxu0 %v3422_v2 }
0x10c7   :  { %3120 = vmatpush3.bf16.msra.mxu0 %v3298_v19  ;;  %v3311_v19 = vld [vmem:[%s4479_s11] sm:$0xff]  }
0x10c8   :  { %3121 = vmatprep.subr.bf16.mxu0 %v3422_v2 }
0x10cb   :  { %3122 = vmatpush3.bf16.msra.mxu0 %v3299_v47 }
0x10cc   :  { %3123 = vmatprep.subr.bf16.mxu0 %v3422_v2 }
0x10cf   :  { %3124 = vmatpush3.bf16.msra.mxu0 %v3300_v53 }
0x10d0   :  { %3125 = vmatprep.subr.bf16.mxu0 %v3422_v2 }
0x10d3   :  { %3126 = vmatpush3.bf16.msra.mxu0 %v3301_v23 }
0x10d4   :  { %3127 = vmatprep.subr.bf16.mxu0 %v3422_v2 }
0x10d7   :  { %3128 = vmatpush3.bf16.msra.mxu0 %v3302_v24 }
0x10d8   :  { %3129 = vmatprep.subr.bf16.mxu0 %v3422_v2 }
0x10db   :  { %3130 = vmatpush3.bf16.msra.mxu0 %v3303_v27 }
0x10dc   :  { %3155 = vmatprep.subr.bf16.mxu0 %v3422_v2 }
0x117e   :  { %v1811_v9 = vpop.f32.mrf.mxu0 }
0x117f   :  { %v1812_v10 = vadd.f32 %v1811_v9, %v1728_v8 }
0x1180   :  { %v3093_v31 = vpop.f32.mrf.mxu0 }
0x1181   :  { %v1818_v11 = vadd.f32 %v1812_v10, %v4091_v25 }
0x1182   :  { %v1814_v12 = vpop.f32.mrf.mxu0 }
0x1183   :  { %v1815_v22 = vadd.f32 %v1814_v12, %v1728_v8  ;;  %1820 = vadd.xlane.f32.xlu1 %v1818_v11 }
0x1184   :  { %v3094_v13 = vpop.f32.mrf.mxu0 }
0x1185   :  { %v1819_v15 = vadd.f32 %v1815_v22, %v4093_v26  ;;  %v3289_v26 = vld [vmem:[%s4477_s9 + $0x70] sm:$0xff]  }
0x1186   :  { %3098 = vmatpush3.bf16.msra.mxu1 %v3289_v26 }
0x1187   :  { %1822 = vadd.xlane.f32.xlu1 %v1819_v15  ;;  %3099 = vmatprep.subr.bf16.mxu1 %v3422_v2 }
0x118a   :  { %3100 = vmatpush3.bf16.msra.mxu1 %v3290_v55 }
0x118b   :  { %3101 = vmatprep.subr.bf16.mxu1 %v3422_v2 }
0x118e   :  { %3102 = vmatpush3.bf16.msra.mxu1 %v3291_v56 }
0x118f   :  { %3103 = vmatprep.subr.bf16.mxu1 %v3422_v2 }
0x1192   :  { %3104 = vmatpush3.bf16.msra.mxu1 %v3292_v57 }
0x1193   :  { %3105 = vmatprep.subr.bf16.mxu1 %v3422_v2 }
0x1196   :  { %3106 = vmatpush3.bf16.msra.mxu1 %v3293_v59  ;;  %v2004_v59 = vrot.slane %v4118_v4, %v3698_v21  ;;  %v3304_v4 = vld [vmem:[%s4479_s11 + $0x38] sm:$0xff]  }
0x1197   :  { %3107 = vmatprep.subr.bf16.mxu1 %v3422_v2 }
0x119a   :  { %3108 = vmatpush3.bf16.msra.mxu1 %v3294_v33 }
0x119b   :  { %3109 = vmatprep.subr.bf16.mxu1 %v3422_v2 }
0x119e   :  { %3110 = vmatpush3.bf16.msra.mxu1 %v3295_v35 }
0x119f   :  { %3135 = vmatprep.subr.bf16.mxu1 %v3422_v2 }
0x120c   :  { %v1821_v51 = vpop.xlane.xlu1 %1820 }
0x120d   :  { %v1824_v43 = vmul.f32 0.0078125, %v1821_v51 }
0x120f   :  { %v1826_v42 = vsub.f32 %v1818_v11, %v1824_v43 }
0x1210   :  { %v1823_v41 = vpop.xlane.xlu1 %1822 }
0x1211   :  { %v1825_v48 = vmul.f32 0.0078125, %v1823_v41  ;;  %v1828_v25 = vmul.f32 %v1826_v42, %v1826_v42 }
0x1213   :  { %v1827_v50 = vsub.f32 %v1819_v15, %v1825_v48  ;;  %1830 = vadd.xlane.f32.xlu1 %v1828_v25 }
0x1215   :  { %v1829_v52 = vmul.f32 %v1827_v50, %v1827_v50 }
0x1217   :  { %1832 = vadd.xlane.f32.xlu1 %v1829_v52 }
0x129c   :  { %v1831_v37 = vpop.xlane.xlu1 %1830 }
0x129d   :  { %v1834_v38 = vmul.f32 0.0078125, %v1831_v37 }
0x129f   :  { %v1836_v49 = vadd.f32 1e-12, %v1834_v38 }
0x12a0   :  { %v1833_v32 = vpop.xlane.xlu1 %1832 }
0x12a1   :  { %3352 = vrsqrt.f32 %v1836_v49  ;;  %v1835_v39 = vmul.f32 0.0078125, %v1833_v32 }
0x12a3   :  { %v1837_v44 = vadd.f32 1e-12, %v1835_v39 }
0x12a5   :  { %3354 = vrsqrt.f32 %v1837_v44 }
0x12ae   :  { %v3353_v45 = vpop.eup %3352 }
0x12af   :  { %v1840_v46 = vmul.f32 %v3353_v45, %v1826_v42 }
0x12b1   :  { %v1846_v61 = vmul.f32 %v1845_v58, %v1840_v46 }
0x12b2   :  { %v3355_v60 = vpop.eup %3354 }
0x12b3   :  { %v1841_v63 = vmul.f32 %v3355_v60, %v1827_v50  ;;  %v4274_v62 = vadd.f32 %v1851_v54, %v1846_v61 }
0x12b5   :  { %v1847_v1 = vmul.f32 %v1845_v58, %v1841_v63 }
0x12b7   :  { %v4276_v3 = vadd.f32 %v1851_v54, %v1847_v1  ;;  %v3305_v1 = vld [vmem:[%s4479_s11 + $0x30] sm:$0xff]  }
0x12b9   :  { %v1854_v16 = vpack.c.bf16 %v4276_v3, %v4274_v62 }
0x12bb   :  { %3112 = vmatmul.mubr.bf16.vlgmr.msra.gmra.mxu1 %v1854_v16  ;;  %v3308_v16 = vld [vmem:[%s4479_s11 + $0x18] sm:$0xff]  }
0x12bc   :  { %3151 = vmatprep.mubr.msk.bf16.mxu1 %vm3423_vm0, %v3422_v2  ;;  %3136 = vmatpush3.bf16.msra.mxu1 %v3304_v4  ;;  %v3319_v4 = vld [vmem:[%s4480_s12] sm:$0xff]  }
0x12bd   :  { %3137 = vmatprep.subr.bf16.mxu1 %v3422_v2 }
0x12c0   :  { %3138 = vmatpush3.bf16.msra.mxu1 %v3305_v1 }
0x12c1   :  { %3139 = vmatprep.subr.bf16.mxu1 %v3422_v2 }
0x137b   :  { %v1958_v5 = vpop.f32.mrf.mxu1 }
0x137c   :  { %v1959_v6 = vadd.f32 %v1958_v5, %v1875_v29  ;;  %v2546_v5 = vld [vmem:[%s4481_s13 + $0x18] sm:$0x3]  ;;  %s2133_s13 = scalar_lea.vmem [#allocation2], %s2132_s3  ;;  %s4402_s3 = sld [smem:[#allocation6 + $0x9]] }
0x137d   :  { %v3113_v8 = vpop.f32.mrf.mxu1 }
0x137e   :  { %v1967_v9 = vmul.f32 0.044715, %v1959_v6  ;;  %v1965_v50 = vmul.f32 0.5, %v1959_v6 }
0x137f   :  { %v1961_v10 = vpop.f32.mrf.mxu1 }
0x1380   :  { %v1969_v31 = vmul.f32 %v1967_v9, %v1959_v6  ;;  %v1962_v11 = vadd.f32 %v1961_v10, %v1875_v29  ;;  %v2127_v9 = vrot.slane %v2546_v5, %v3670_v7  ;;  %v4361_v7 = vld [vmem:[%s4482_s14] sm:$0xff]  ;;  %s3393_s14 = scalar_lea.vmem %s2473_s29, 32 }
0x1381   :  { %v3114_v12 = vpop.f32.mrf.mxu1  ;;  %p3394_p10 = scmp.ne.s32.totalorder %s2473_s29, %s3393_s14  ;;  %p3399_p12 = scmp.lt.s32.totalorder %s3393_s14, %s3393_s14 }
0x1382   :  { %v1971_v22 = vmul.f32 %v1969_v31, %v1959_v6  ;;  %v1968_v13 = vmul.f32 0.044715, %v1962_v11  ;;  %v1966_v52 = vmul.f32 0.5, %v1962_v11 }
0x1383   :  { %p3400_p13 = por %p3399_p12, %p3398_p11 }
0x1384   :  { %v1973_v15 = vadd.f32 %v1971_v22, %v1959_v6  ;;  %v1970_v34 = vmul.f32 %v1968_v13, %v1962_v11  ;;  %v2121_v6 = vrot.slane %v2546_v5, %v3662_v0 }
0x1385   :  { %p3401_p0 = pnand %p3400_p13, %p3394_p10 }
0x1386   :  { %v1975_v51 = vmul.f32 0.7978846, %v1973_v15  ;;  %v1972_v43 = vmul.f32 %v1970_v34, %v1962_v11 }
0x1388   :  { %3356 = vtanh.f32 %v1975_v51  ;;  %v1974_v42 = vadd.f32 %v1972_v43, %v1962_v11 }
0x138a   :  { %v1976_v41 = vmul.f32 0.7978846, %v1974_v42 }
0x138c   :  { %3358 = vtanh.f32 %v1976_v41  ;;  %v2163_v41 = vrot.slane %v4361_v7, %v3690_v18  ;;  %v3312_v18 = vld [vmem:[%s4480_s12 + $0x38] sm:$0xff]  }
0x1395   :  { %v3357_v48 = vpop.eup %3356 }
0x1396   :  { %v1979_v20 = vadd.f32 1.0, %v3357_v48 }
0x1398   :  { %v1981_v55 = vmul.f32 %v1979_v20, %v1965_v50 }
0x1399   :  { %v3359_v25 = vpop.eup %3358 }
0x139a   :  { %v1980_v26 = vadd.f32 1.0, %v3359_v25 }
0x139c   :  { %v1982_v56 = vmul.f32 %v1980_v26, %v1966_v52 }
0x139e   :  { %v1983_v57 = vpack.c.bf16 %v1982_v56, %v1981_v55 }
0x13a0   :  { %3132 = vmatmul.mubr.bf16.vlgmr.msra.gmra.mxu0 %v1983_v57 }
0x13a1   :  { %3171 = vmatprep.mubr.msk.bf16.mxu0 %vm3423_vm0, %v3422_v2  ;;  %3156 = vmatpush3.bf16.msra.mxu0 %v3312_v18 }
0x13a2   :  { %3157 = vmatprep.subr.bf16.mxu0 %v3422_v2 }
0x1460   :  { %v2087_v33 = vpop.f32.mrf.mxu0 }
0x1461   :  { %v2088_v35 = vadd.f32 %v2087_v33, %v2004_v59 }
0x1462   :  { %v3133_v37 = vpop.f32.mrf.mxu0 }
0x1463   :  { %v2094_v38 = vadd.f32 %v2088_v35, %v4274_v62  ;;  %v3306_v62 = vld [vmem:[%s4479_s11 + $0x28] sm:$0xff]  }
0x1464   :  { %v2090_v49 = vpop.f32.mrf.mxu0  ;;  %3140 = vmatpush3.bf16.msra.mxu1 %v3306_v62 }
0x1465   :  { %v2091_v32 = vadd.f32 %v2090_v49, %v2004_v59  ;;  %2096 = vadd.xlane.f32.xlu1 %v2094_v38  ;;  %3141 = vmatprep.subr.bf16.mxu1 %v3422_v2 }
0x1466   :  { %v3134_v39 = vpop.f32.mrf.mxu0 }
0x1467   :  { %v2095_v44 = vadd.f32 %v2091_v32, %v4276_v3  ;;  %v3307_v3 = vld [vmem:[%s4479_s11 + $0x20] sm:$0xff]   ;;  %s2678_s11 = sld [smem:[#allocation3 + $0x1]]  ;;  %v3313_v32 = vld [vmem:[%s4480_s12 + $0x30] sm:$0xff]  }
0x1468   :  { %3142 = vmatpush3.bf16.msra.mxu1 %v3307_v3  ;;  %3158 = vmatpush3.bf16.msra.mxu0 %v3313_v32 }
0x1469   :  { %2098 = vadd.xlane.f32.xlu1 %v2095_v44  ;;  %3143 = vmatprep.subr.bf16.mxu1 %v3422_v2 }
0x146a   :  { %3159 = vmatprep.subr.bf16.mxu0 %v3422_v2 }
0x146c   :  { %3144 = vmatpush3.bf16.msra.mxu1 %v3308_v16  ;;  %v2278_v16 = vrot.slane %v4361_v7, %v3901_v40  ;;  %v2411_v40 = vstv %s2697_s25 }
0x146d   :  { %3145 = vmatprep.subr.bf16.mxu1 %v3422_v2  ;;  %s2136_s8 = scalar_lea.vmem [#allocation2], %s2678_s11  ;;  %s2702_s11 = sld [smem:[#allocation6 + $0x8]]  ;;  %vm4411_vm9 = vcmp.eq.s32.totalorder %v3557_v14, %v2411_v40 }
0x1470   :  { %3146 = vmatpush3.bf16.msra.mxu1 %v3309_v17 }
0x1471   :  { %3147 = vmatprep.subr.bf16.mxu1 %v3422_v2 }
0x1474   :  { %3148 = vmatpush3.bf16.msra.mxu1 %v3310_v28 }
0x1475   :  { %3149 = vmatprep.subr.bf16.mxu1 %v3422_v2 }
0x1478   :  { %3150 = vmatpush3.bf16.msra.mxu1 %v3311_v19  ;;  %v2283_v19 = vrot.slane %v4361_v7, %v3939_v30 }
0x14ee   :  { %v2097_v45 = vpop.xlane.xlu1 %2096 }
0x14ef   :  { %v2100_v46 = vmul.f32 0.0078125, %v2097_v45 }
0x14f1   :  { %v2102_v58 = vsub.f32 %v2094_v38, %v2100_v46 }
0x14f2   :  { %v2099_v60 = vpop.xlane.xlu1 %2098 }
0x14f3   :  { %v2101_v63 = vmul.f32 0.0078125, %v2099_v60  ;;  %v2104_v61 = vmul.f32 %v2102_v58, %v2102_v58  ;;  %v3314_v60 = vld [vmem:[%s4480_s12 + $0x28] sm:$0xff]  }
0x14f4   :  { %3160 = vmatpush3.bf16.msra.mxu0 %v3314_v60 }
0x14f5   :  { %v2103_v54 = vsub.f32 %v2095_v44, %v2101_v63  ;;  %2106 = vadd.xlane.f32.xlu1 %v2104_v61  ;;  %v3315_v63 = vld [vmem:[%s4480_s12 + $0x20] sm:$0xff]   ;;  %3161 = vmatprep.subr.bf16.mxu0 %v3422_v2  ;;  %v3316_v61 = vld [vmem:[%s4480_s12 + $0x18] sm:$0xff]  }
0x14f7   :  { %v2105_v21 = vmul.f32 %v2103_v54, %v2103_v54 }
0x14f8   :  { %3162 = vmatpush3.bf16.msra.mxu0 %v3315_v63 }
0x14f9   :  { %2108 = vadd.xlane.f32.xlu1 %v2105_v21  ;;  %3163 = vmatprep.subr.bf16.mxu0 %v3422_v2  ;;  %v3318_v21 = vld [vmem:[%s4480_s12 + $0x8] sm:$0xff]  }
0x14fc   :  { %3164 = vmatpush3.bf16.msra.mxu0 %v3316_v61 }
0x14fd   :  { %3165 = vmatprep.subr.bf16.mxu0 %v3422_v2 }
0x157e   :  { %v2107_v47 = vpop.xlane.xlu1 %2106 }
0x157f   :  { %v2110_v53 = vmul.f32 0.0078125, %v2107_v47 }
0x1581   :  { %v2112_v23 = vadd.f32 1e-12, %v2110_v53 }
0x1582   :  { %v2109_v24 = vpop.xlane.xlu1 %2108 }
0x1583   :  { %3360 = vrsqrt.f32 %v2112_v23  ;;  %v2111_v27 = vmul.f32 0.0078125, %v2109_v24  ;;  %v2398_v24 = vstv %s2695_s24 }
0x1584   :  { %vm2399_vm8 = vcmp.eq.s32.totalorder %v3557_v14, %v2398_v24 }
0x1585   :  { %v2113_v29 = vadd.f32 1e-12, %v2111_v27  ;;  %v2414_v27 = vstv %s2698_s26 }
0x1586   :  { %vm4416_vm10 = vcmp.eq.s32.totalorder %v3557_v14, %v2414_v27 }
0x1587   :  { %3362 = vrsqrt.f32 %v2113_v29  ;;  %v2402_v29 = vstv %s2696_s6  ;;  %vm2416_vm13 = vmor %vm4411_vm9, %vm4416_vm10 }
0x1588   :  { %vm2403_vm12 = vcmp.eq.s32.totalorder %v3557_v14, %v2402_v29 }
0x1590   :  { %v3361_v8 = vpop.eup %3360 }
0x1591   :  { %v2116_v10 = vmul.f32 %v3361_v8, %v2102_v58  ;;  %v2418_v8 = vstv %s2699_s0 }
0x1592   :  { %vm2419_vm14 = vcmp.eq.s32.totalorder %v3557_v14, %v2418_v8 }
0x1593   :  { %v2122_v31 = vmul.f32 %v2121_v6, %v2116_v10  ;;  %v2430_v10 = vstv %s2701_s27  ;;  %vm2420_vm2 = vmor %vm2416_vm13, %vm2419_vm14  ;;  %vm2460_vm13 = vcmask 15360   ;;  %vm2462_vm14 = vcmask 23552  }
0x1594   :  { %v3363_v11 = vpop.eup %3362  ;;  %vm4436_vm1 = vcmp.eq.s32.totalorder %v3557_v14, %v2430_v10 }
0x1595   :  { %v2128_v12 = vadd.f32 %v2127_v9, %v2122_v31  ;;  %v2117_v22 = vmul.f32 %v3363_v11, %v2103_v54  ;;  %v3317_v54 = vld [vmem:[%s4480_s12 + $0x10] sm:$0xff]   ;;  %s2394_s12 = sld [smem:[#allocation6]]  ;;  %v2305_v31 = vrot.slane %v4361_v7, %v3944_v36  ;;  %v2443_v36 = vstv %s4402_s3 }
0x1596   :  { %3166 = vmatpush3.bf16.msra.mxu0 %v3317_v54 }
0x1597   :  { %2130 = vst [vmem:[#allocation2] sm:$0xff] %v2128_v12  ;;  %v2123_v13 = vmul.f32 %v2121_v6, %v2117_v22  ;;  %3167 = vmatprep.subr.bf16.mxu0 %v3422_v2  ;;  %v2434_v22 = vstv %s2702_s11 }
0x1598   :  { %vm2435_vm4 = vcmp.eq.s32.totalorder %v3557_v14, %v2434_v22 }
0x1599   :  { %v2129_v15 = vadd.f32 %v2127_v9, %v2123_v13  ;;  %v2427_v9 = vstv %s2700_s1 }
0x159a   :  { %3168 = vmatpush3.bf16.msra.mxu0 %v3318_v21  ;;  %vm4431_vm0 = vcmp.eq.s32.totalorder %v3557_v14, %v2427_v9 }
0x159b   :  { %2131 = vst [vmem:[#allocation2 + $0x8] sm:$0xff] %v2129_v15  ;;  %3169 = vmatprep.subr.bf16.mxu0 %v3422_v2  ;;  %v2395_v2 = vstv %s2394_s12  ;;  %vm2432_vm3 = vmor %vm4431_vm0, %vm4436_vm1 }
0x159c   :  { %vm4405_vm7 = vcmp.eq.s32.totalorder %v3557_v14, %v2395_v2 }
0x159d   :  { %vm2400_vm11 = vmor %vm4405_vm7, %vm2399_vm8 }
0x159e   :  { %3170 = vmatpush3.bf16.msra.mxu0 %v3319_v4  ;;  %vm2404_vm15 = vmor %vm2400_vm11, %vm2403_vm12  ;;  %vm2458_vm12 = vcmask 7168  }
0x159f   :  { %vm2436_vm8 = vmor %vm2432_vm3, %vm2435_vm4 }
0x15a2   :  { %v2137_v34 = vld [vmem:[%s2136_s8] sm:$0x1]  ;;  %s2704_s8 = sld [smem:[#allocation6 + $0xa]] }
0x15a3   :  { %v2139_v51 = vrot.slane %v2137_v34, 7  ;;  %v2134_v0 = vld [vmem:[%s2133_s13] sm:$0x1]  ;;  %s2705_s13 = sld [smem:[#allocation6 + $0xb]]  ;;  %v3425_v34 = vmov -1e+30  }
0x15a5   :  { %v2142_v43 = vsel %vm2141_vm5, %v2134_v0, %v2139_v51  ;;  %v2405_v51 = vsel %vm2404_vm15, 0.0, %v3425_v34  ;;  %vm4447_vm5 = vcmp.eq.s32.totalorder %v3557_v14, %v2443_v36  ;;  %vm2464_vm15 = vcmask 25600  }
0x15a6   :  { %v2143_v42 = vpack.c.bf16 %v2142_v43, %v2142_v43 }
0x15a8   :  { %3152 = vmatmul.mubr.bf16.vlgmr.msra.gmra.mxu1 %v2143_v42  ;;  %v2446_v13 = vstv %s2704_s8 }
0x15a9   :  { %vm4452_vm7 = vcmp.eq.s32.totalorder %v3557_v14, %v2446_v13  ;;  %v2450_v7 = vstv %s2705_s13 }
0x15aa   :  { %vm2448_vm9 = vmor %vm4447_vm5, %vm4452_vm7  ;;  %vm2451_vm10 = vcmp.eq.s32.totalorder %v3557_v14, %v2450_v7 }
0x15ab   :  { %vm2452_vm11 = vmor %vm2448_vm9, %vm2451_vm10 }
0x1668   :  { %v2246_v48 = vpop.f32.mrf.mxu1 }
0x1669   :  { %v2247_v20 = vadd.f32 %v2246_v48, %v2163_v41  ;;  %v2421_v48 = vsel %vm2420_vm2, 0.0, %v3425_v34 }
0x166a   :  { %v3153_v25 = vpop.f32.mrf.mxu1 }
0x166b   :  { %v2253_v50 = vmul.f32 0.044715, %v2247_v20  ;;  %v2252_v35 = vmul.f32 0.5, %v2247_v20 }
0x166c   :  { %v2249_v52 = vpop.f32.mrf.mxu1 }
0x166d   :  { %v2254_v26 = vmul.f32 %v2253_v50, %v2247_v20 }
0x166e   :  { %v3154_v55 = vpop.f32.mrf.mxu1 }
0x166f   :  { %v2255_v56 = vmul.f32 %v2254_v26, %v2247_v20  ;;  %v2437_v55 = vsel %vm2436_vm8, 0.0, %v3425_v34 }
0x1671   :  { %v2256_v57 = vadd.f32 %v2255_v56, %v2247_v20 }
0x1673   :  { %v2257_v59 = vmul.f32 0.7978846, %v2256_v57 }
0x1675   :  { %3364 = vtanh.f32 %v2257_v59  ;;  %v2453_v59 = vsel %vm2452_vm11, 0.0, %v3425_v34 }
0x1682   :  { %v3365_v33 = vpop.eup %3364 }
0x1683   :  { %v2259_v37 = vadd.f32 1.0, %v3365_v33 }
0x1685   :  { %v2260_v38 = vmul.f32 %v2259_v37, %v2252_v35 }
0x1687   :  { %v2262_v49 = vsel %vm2261_vm6, %v2260_v38, 0.0 }
0x1688   :  { %2263 = vadd.xlane.f32.xlu1 %v2262_v49 }
0x1711   :  { %v2264_v39 = vpop.xlane.xlu1 %2263 }
0x1712   :  { %v2265_v44 = vmul.f32 0.0078125, %v2264_v39 }
0x1714   :  { %v2266_v45 = vsub.f32 %v2260_v38, %v2265_v44 }
0x1716   :  { %v2267_v46 = vmul.f32 %v2266_v45, %v2266_v45 }
0x1718   :  { %v2268_v58 = vsel %vm2261_vm6, %v2267_v46, 0.0 }
0x1719   :  { %2269 = vadd.xlane.f32.xlu1 %v2268_v58 }
0x17a2   :  { %v2270_v1 = vpop.xlane.xlu1 %2269 }
0x17a3   :  { %v2271_v62 = vmul.f32 0.0078125, %v2270_v1 }
0x17a5   :  { %v2272_v3 = vadd.f32 1e-12, %v2271_v62 }
0x17a7   :  { %3366 = vrsqrt.f32 %v2272_v3 }
0x17b4   :  { %v3367_v17 = vpop.eup %3366 }
0x17b5   :  { %v2274_v28 = vmul.f32 %v3367_v17, %v2266_v45 }
0x17b7   :  { %v2279_v47 = vmul.f32 %v2278_v16, %v2274_v28 }
0x17b9   :  { %v2284_v53 = vadd.f32 %v2283_v19, %v2279_v47 }
0x17bb   :  { %v2285_v23 = vpack.c.bf16 %v2284_v53, %v2284_v53 }
0x17bd   :  { %3172 = vmatmul.mubr.bf16.vlgmr.msra.gmra.mxu0 %v2285_v23 }
0x187d   :  { %v2388_v15 = vpop.f32.mrf.mxu0 }
0x187e   :  { %v2389_v0 = vadd.f32 %v2388_v15, %v2305_v31 }
0x187f   :  { %v3173_v41 = vpop.f32.mrf.mxu0 }
0x1880   :  { %v2406_v20 = vadd.f32 %v2405_v51, %v2389_v0  ;;  %v2422_v52 = vadd.f32 %v2421_v48, %v2389_v0  ;;  %v2438_v57 = vadd.f32 %v2437_v55, %v2389_v0  ;;  %v2454_v35 = vadd.f32 %v2453_v59, %v2389_v0 }
0x1881   :  { %v2391_v25 = vpop.f32.mrf.mxu0 }
0x1882   :  { %v2407_v50 = vsel %vm2261_vm6, %v2406_v20, -inf  ;;  %v2423_v56 = vsel %vm2261_vm6, %v2422_v52, -inf  ;;  %v2439_v33 = vsel %vm2261_vm6, %v2438_v57, -inf  ;;  %v2455_v37 = vsel %vm2261_vm6, %v2454_v35, -inf }
0x1883   :  { %2408 = vmax.xlane.f32.xlu1 %v2407_v50  ;;  %v3174_v26 = vpop.f32.mrf.mxu0 }
0x1887   :  { %2424 = vmax.xlane.f32.xlu1 %v2423_v56 }
0x188b   :  { %2440 = vmax.xlane.f32.xlu1 %v2439_v33 }
0x188f   :  { %2456 = vmax.xlane.f32.xlu1 %v2455_v37 }
0x190c   :  { %v2409_v14 = vpop.xlane.xlu1 %2408 }
0x1910   :  { %v2425_v38 = vpop.xlane.xlu1 %2424 }
0x1911   :  { %v2459_v18 = vsel %vm2458_vm12, %v2409_v14, %v2425_v38 }
0x1914   :  { %v2441_v49 = vpop.xlane.xlu1 %2440 }
0x1915   :  { %v2461_v32 = vsel %vm2460_vm13, %v2459_v18, %v2441_v49 }
0x1918   :  { %v2457_v39 = vpop.xlane.xlu1 %2456 }
0x1919   :  { %v2463_v44 = vsel %vm2462_vm14, %v2461_v32, %v2457_v39 }
0x191a   :  { %2465 = vst.msk [vmem:[#allocation8] sm:$0x3] %vm2464_vm15, %v2463_v44 }
0x191b   :  { %3404 = shalt.err (!%p3401_p0)
}
0x191c   :  { %2475 = dma.vmem_to_hbm [thread:$0]  %s2473_s29, 32, %s4483_s15, [#allocation4]  }
0x191d   :  { %3417 = dma.done.wait [#allocation4], 32  }
0x191e   :  { %3418 = vsyncadd [#allocation4], 4294967264 }
0x191f   :  { %2479 = vsyncpa [#allocation4], 1 }
0x1920   :  { %2480 = vsyncpa [#allocation5], 1 }
0x1921   :  { %2481 = vsyncpa [#allocation7], 1 }

</bundles_post_ra>
